<compile_context>
chip_gen: v7x
topology: tpu7x:2x2x1
jax: 0.10.0
libtpu: 0.0.40
codegen_flags: <defaults>
</compile_context>

<pallas_src>
import math

import jax
import jax.numpy as jnp
from jax.experimental import pallas as pl
from jax.experimental.pallas import tpu as pltpu


def _disc_kernel(x_ref, w0_ref, b0_ref, w1_ref, b1_ref, w2_ref, b2_ref, o_ref):
    """One batch tile (H = 256 hidden, TB = batch tile width).
       x_ref (2, TB) f32 | w0 (H, 2) bf16 | b0 (H, 1) bf16
       w1 (H, H) bf16    | b1 (H, 1) f32  | w2 (H, 1) f32 | b2 (1,) f32 in SMEM
       o_ref (1, TB) f32
    """
    # ---- hidden0: Linear(2 -> H) + LeakyReLU(0.2), all bf16 --------------------
    # K=2 would waste a full MXU pass; two VPU broadcast mul-adds in bf16 instead
    # (bf16 packs 16x128 per vreg -> 2x elementwise throughput on v6e/v7x, and the
    # separate f32->bf16 cast of the full (H, TB) plane is gone).
    x = x_ref[...].astype(jnp.bfloat16)                         # (2, TB) bf16 (tiny cast)
    h0 = (w0_ref[:, 0:1] * x[0:1, :]
          + w0_ref[:, 1:2] * x[1:2, :]
          + b0_ref[...])                                        # (H, TB) bf16
    h0 = jnp.maximum(h0, 0.2 * h0)                              # LeakyReLU(0.2): mul+max
    # Dropout(0.3): eval-mode identity (no-op).

    # ---- hidden1: Linear(H -> H) + LeakyReLU(0.2) -------------------------------
    # The only MXU matmul: bf16 inputs, f32 accumulation.
    h1 = jnp.dot(w1_ref[...], h0,
                 preferred_element_type=jnp.float32) + b1_ref[...]   # (H, TB) f32
    h1 = jnp.maximum(h1, 0.2 * h1)                              # LeakyReLU(0.2)
    # Dropout(0.3): eval-mode identity (no-op).

    # ---- out: Linear(H -> 1) + Sigmoid ------------------------------------------
    # N=1 matmul -> VPU multiply + cross-sublane reduce; keeps the MXU free.
    logits = jnp.sum(h1 * w2_ref[...], axis=0, keepdims=True) + b2_ref[0]   # (1, TB)
    # Exact sigmoid: the (1, TB) row is ~0.4% of the elementwise volume, so the
    # exact divide costs nothing and tightens accuracy.
    o_ref[...] = (1.0 / (1.0 + jnp.exp(-logits))).astype(o_ref.dtype)


def _round_up(n, m):
    return ((n + m - 1) // m) * m


def discriminator_forward(x, params, *, block_rows=4096):
    """x: (B, 2) float32.  params: dict (see init_params).  Returns (B, 1) float32."""
    B, n_features = x.shape
    w0, b0 = params["w0"], params["b0"]        # (H, 2) bf16, (H, 1) bf16
    w1, b1 = params["w1"], params["b1"]        # (H, H) bf16, (H, 1) f32
    w2, b2 = params["w2"], params["b2"]        # (H, 1) f32,  (1,)  f32
    H = w0.shape[0]
    assert n_features == w0.shape[1]

    # Batch tile: lane-dense (multiple of 128); 512-aligned once the batch is big
    # enough so every MXU pass uses full width.
    align = 512 if B >= 512 else 128
    tb = _round_up(min(block_rows, B), align)
    # Prefer >= 2 grid steps so ("parallel",) can shard across v7x's two TensorCores.
    if B > align and pl.cdiv(B, tb) < 2:
        tb = _round_up(pl.cdiv(B, 2), align)
    num_blocks = pl.cdiv(B, tb)
    B_pad = num_blocks * tb

    # Feature-major input: batch mapped onto the 128-lane axis.
    x_t = jnp.transpose(x).astype(jnp.float32)                  # (2, B)
    if B_pad != B:
        x_t = jnp.pad(x_t, ((0, 0), (0, B_pad - B)))

    # Weights/biases: constant index_map keeps them VMEM-resident across grid steps.
    const = lambda shape: pl.BlockSpec(shape, lambda i: (0, 0))

    out_t = pl.pallas_call(
        _disc_kernel,
        out_shape=jax.ShapeDtypeStruct((1, B_pad), jnp.float32),
        grid=(num_blocks,),
        in_specs=[
            pl.BlockSpec((n_features, tb), lambda i: (0, i)),    # x tile
            const((H, n_features)),                              # w0 (bf16)
            const((H, 1)),                                       # b0 (bf16)
            const((H, H)),                                       # w1 (bf16)
            const((H, 1)),                                       # b1
            const((H, 1)),                                       # w2 (as column)
            pl.BlockSpec(memory_space=pltpu.MemorySpace.SMEM),   # b2 scalar
        ],
        out_specs=pl.BlockSpec((1, tb), lambda i: (0, i)),
        compiler_params=pltpu.CompilerParams(
            dimension_semantics=("parallel",),                   # megacore on v7x
            vmem_limit_bytes=48 * 1024 * 1024),                  # fits v7x 64 MiB
    )(x_t, w0, b0, w1, b1, w2, b2)

    return out_t.reshape(B_pad, 1)[:B]


def init_params(key):
    """PyTorch nn.Linear default init (U[-1/sqrt(fan_in), +]); kernel-native layout."""
    ks = jax.random.split(key, 6)

    def linear(kw, kb, fan_in, fan_out):
        bound = 1.0 / math.sqrt(fan_in)
        w = jax.random.uniform(kw, (fan_out, fan_in), jnp.float32, -bound, bound)
        b = jax.random.uniform(kb, (fan_out,), jnp.float32, -bound, bound)
        return w, b

    w0, b0 = linear(ks[0], ks[1], 2, 256)      # PyTorch weight shape (out, in)
    w1, b1 = linear(ks[2], ks[3], 256, 256)
    w2, b2 = linear(ks[4], ks[5], 256, 1)
    return {
        "w0": w0.astype(jnp.bfloat16),             # (256, 2)   bf16 (bf16 layer-0 chain)
        "b0": b0.reshape(256, 1).astype(jnp.bfloat16),  # (256, 1) bf16
        "w1": w1.astype(jnp.bfloat16),             # (256, 256) bf16 (MXU inputs)
        "b1": b1.reshape(256, 1),                  # (256, 1)   f32
        "w2": w2.reshape(256, 1),                  # (256, 1)   f32 (= W2^T column)
        "b2": b2,                                  # (1,)       f32
    }


def _reference(x, p):
    """Pure-JAX reference (f32 activations; bf16 params dequantized)."""
    h0 = x @ p["w0"].astype(jnp.float32).T + p["b0"].astype(jnp.float32).reshape(1, -1)
    h0 = jnp.where(h0 >= 0, h0, 0.2 * h0)
    h1 = h0 @ p["w1"].astype(jnp.float32).T + p["b1"].reshape(1, -1)
    h1 = jnp.where(h1 >= 0, h1, 0.2 * h1)
    logits = h1 @ p["w2"] + p["b2"]
    return jax.nn.sigmoid(logits)


if __name__ == "__main__":
    key = jax.random.PRNGKey(0)
    k_param, k_x, k_x2 = jax.random.split(key, 3)
    params = init_params(k_param)

    # Small batch (features fixed at 2 by the module): single-block path.
    B = 8
    x = jax.random.normal(k_x, (B, 2), dtype=jnp.float32)
    out = jax.block_until_ready(discriminator_forward(x, params))
    ref = _reference(x, params)
    assert out.shape == (B, 1)
    # bf16 layer-0 arithmetic + bf16 MXU matmul -> loosened vs. the f32 reference.
    assert jnp.allclose(out, ref, atol=1e-2, rtol=1e-2)

    # Multi-block path (2 grid steps + batch padding) to exercise the tiled grid.
    B2 = 1280
    x2 = jax.random.normal(k_x2, (B2, 2), dtype=jnp.float32)
    out2 = jax.block_until_ready(discriminator_forward(x2, params))
    ref2 = _reference(x2, params)
    assert out2.shape == (B2, 1)
    assert jnp.allclose(out2, ref2, atol=1e-2, rtol=1e-2)

    print("KERNEL_OK")
</pallas_src>

<mosaic_0001>
module attributes {stable_mosaic.version = 11 : i64} {
  func.func @_disc_kernel(%arg0: i32, %arg1: memref<2x128xf32, #tpu.memory_space<vmem>>, %arg2: memref<256x2xbf16, #tpu.memory_space<vmem>>, %arg3: memref<256x1xbf16, #tpu.memory_space<vmem>>, %arg4: memref<256x256xbf16, #tpu.memory_space<vmem>>, %arg5: memref<256x1xf32, #tpu.memory_space<vmem>>, %arg6: memref<256x1xf32, #tpu.memory_space<vmem>>, %arg7: memref<1xf32, #tpu.memory_space<smem>>, %arg8: memref<1x128xf32, #tpu.memory_space<vmem>>) attributes {dimension_semantics = [#tpu.dimension_semantics<parallel>], iteration_bounds = array<i64: 1>, scalar_prefetch = 0 : i64, scratch_operands = 0 : i64, tpu.core_type = #tpu.core_type<tc>, window_params = [{transform_indices = @transform_0, window_bounds = array<i64: 2, 128>}, {pipeline_mode = #tpu.pipeline_mode<synchronous>, transform_indices = @transform_1, window_bounds = array<i64: 256, 2>}, {pipeline_mode = #tpu.pipeline_mode<synchronous>, transform_indices = @transform_2, window_bounds = array<i64: 256, 1>}, {pipeline_mode = #tpu.pipeline_mode<synchronous>, transform_indices = @transform_3, window_bounds = array<i64: 256, 256>}, {pipeline_mode = #tpu.pipeline_mode<synchronous>, transform_indices = @transform_4, window_bounds = array<i64: 256, 1>}, {pipeline_mode = #tpu.pipeline_mode<synchronous>, transform_indices = @transform_5, window_bounds = array<i64: 256, 1>}, {transform_indices = @transform_6, window_bounds = array<i64: 1>}, {transform_indices = @transform_7, window_bounds = array<i64: 1, 128>}]} {
    %c0 = arith.constant 0 : index
    %c0_0 = arith.constant 0 : index
    %0 = vector.load %arg1[%c0, %c0_0] : memref<2x128xf32, #tpu.memory_space<vmem>>, vector<2x128xf32>
    %1 = arith.truncf %0 : vector<2x128xf32> to vector<2x128xbf16>
    %c0_1 = arith.constant 0 : index
    %c0_2 = arith.constant 0 : index
    %2 = vector.load %arg2[%c0_1, %c0_2] : memref<256x2xbf16, #tpu.memory_space<vmem>>, vector<256x1xbf16>
    %3 = vector.extract_strided_slice %1 {offsets = [0, 0], sizes = [1, 128], strides = [1, 1]} : vector<2x128xbf16> to vector<1x128xbf16>
    %4 = vector.broadcast %2 : vector<256x1xbf16> to vector<256x128xbf16>
    %5 = vector.broadcast %3 : vector<1x128xbf16> to vector<256x128xbf16>
    %6 = arith.mulf %4, %5 : vector<256x128xbf16>
    %c0_3 = arith.constant 0 : index
    %c1 = arith.constant 1 : index
    %7 = vector.load %arg2[%c0_3, %c1] : memref<256x2xbf16, #tpu.memory_space<vmem>>, vector<256x1xbf16>
    %8 = vector.extract_strided_slice %1 {offsets = [1, 0], sizes = [1, 128], strides = [1, 1]} : vector<2x128xbf16> to vector<1x128xbf16>
    %9 = vector.broadcast %7 : vector<256x1xbf16> to vector<256x128xbf16>
    %10 = vector.broadcast %8 : vector<1x128xbf16> to vector<256x128xbf16>
    %11 = arith.mulf %9, %10 : vector<256x128xbf16>
    %12 = arith.addf %6, %11 : vector<256x128xbf16>
    %c0_4 = arith.constant 0 : index
    %c0_5 = arith.constant 0 : index
    %13 = vector.load %arg3[%c0_4, %c0_5] : memref<256x1xbf16, #tpu.memory_space<vmem>>, vector<256x1xbf16>
    %14 = vector.broadcast %13 : vector<256x1xbf16> to vector<256x128xbf16>
    %15 = arith.addf %12, %14 : vector<256x128xbf16>
    %cst = arith.constant 2.001950e-01 : bf16
    %16 = vector.broadcast %cst : bf16 to vector<256x128xbf16>
    %17 = arith.mulf %16, %15 : vector<256x128xbf16>
    %18 = arith.maximumf %15, %17 : vector<256x128xbf16>
    %c0_6 = arith.constant 0 : index
    %c0_7 = arith.constant 0 : index
    %19 = vector.load %arg4[%c0_6, %c0_7] : memref<256x256xbf16, #tpu.memory_space<vmem>>, vector<256x256xbf16>
    %cst_8 = arith.constant dense<0.000000e+00> : vector<256x128xf32>
    %20 = tpu.matmul %19, %18, %cst_8 {dimension_numbers = #tpu.dot_dimension_numbers<[1], [0], [0], [1], [0, 0, 1, 1], [], []>} : vector<256x256xbf16>, vector<256x128xbf16>, vector<256x128xf32> -> vector<256x128xf32>
    %c0_9 = arith.constant 0 : index
    %c0_10 = arith.constant 0 : index
    %21 = vector.load %arg5[%c0_9, %c0_10] : memref<256x1xf32, #tpu.memory_space<vmem>>, vector<256x1xf32>
    %22 = vector.broadcast %21 : vector<256x1xf32> to vector<256x128xf32>
    %23 = arith.addf %20, %22 : vector<256x128xf32>
    %cst_11 = arith.constant 2.000000e-01 : f32
    %24 = vector.broadcast %cst_11 : f32 to vector<256x128xf32>
    %25 = arith.mulf %24, %23 : vector<256x128xf32>
    %26 = arith.maximumf %23, %25 : vector<256x128xf32>
    %c0_12 = arith.constant 0 : index
    %c0_13 = arith.constant 0 : index
    %27 = vector.load %arg6[%c0_12, %c0_13] : memref<256x1xf32, #tpu.memory_space<vmem>>, vector<256x1xf32>
    %28 = vector.broadcast %27 : vector<256x1xf32> to vector<256x128xf32>
    %29 = arith.mulf %26, %28 : vector<256x128xf32>
    %cst_14 = arith.constant dense<0.000000e+00> : vector<128xf32>
    %30 = vector.multi_reduction <add>, %29, %cst_14 [0] : vector<256x128xf32> to vector<128xf32>
    %31 = vector.shape_cast %30 : vector<128xf32> to vector<1x128xf32>
    %c0_15 = arith.constant 0 : index
    %32 = memref.load %arg7[%c0_15] : memref<1xf32, #tpu.memory_space<smem>>
    %33 = vector.broadcast %32 : f32 to vector<1x128xf32>
    %34 = arith.addf %31, %33 : vector<1x128xf32>
    %cst_16 = arith.constant 0.000000e+00 : f32
    %35 = vector.broadcast %cst_16 : f32 to vector<1x128xf32>
    %36 = arith.subf %35, %34 : vector<1x128xf32>
    %37 = math.exp %36 : vector<1x128xf32>
    %cst_17 = arith.constant 1.000000e+00 : f32
    %38 = vector.broadcast %cst_17 : f32 to vector<1x128xf32>
    %39 = arith.addf %38, %37 : vector<1x128xf32>
    %cst_18 = arith.constant 1.000000e+00 : f32
    %40 = vector.broadcast %cst_18 : f32 to vector<1x128xf32>
    %41 = arith.divf %40, %39 : vector<1x128xf32>
    %c0_19 = arith.constant 0 : index
    %c0_20 = arith.constant 0 : index
    %42 = vector.load %arg8[%c0_19, %c0_20] : memref<1x128xf32, #tpu.memory_space<vmem>>, vector<1x128xf32>
    tpu.vector_store %arg8[%c0_19, %c0_20], %41 {strides = array<i32>} : memref<1x128xf32, #tpu.memory_space<vmem>>, vector<1x128xf32>,
    return
  }
  func.func @transform_0(%arg0: i32) -> (i32, i32) {
    %c0_i32 = arith.constant 0 : i32
    %c0_i32_0 = arith.constant 0 : i32
    return %c0_i32, %arg0 : i32, i32
  }
  func.func @transform_1(%arg0: i32) -> (i32, i32) {
    %c0_i32 = arith.constant 0 : i32
    %c0_i32_0 = arith.constant 0 : i32
    %c0_i32_1 = arith.constant 0 : i32
    return %c0_i32, %c0_i32_0 : i32, i32
  }
  func.func @transform_2(%arg0: i32) -> (i32, i32) {
    %c0_i32 = arith.constant 0 : i32
    %c0_i32_0 = arith.constant 0 : i32
    %c0_i32_1 = arith.constant 0 : i32
    return %c0_i32, %c0_i32_0 : i32, i32
  }
  func.func @transform_3(%arg0: i32) -> (i32, i32) {
    %c0_i32 = arith.constant 0 : i32
    %c0_i32_0 = arith.constant 0 : i32
    %c0_i32_1 = arith.constant 0 : i32
    return %c0_i32, %c0_i32_0 : i32, i32
  }
  func.func @transform_4(%arg0: i32) -> (i32, i32) {
    %c0_i32 = arith.constant 0 : i32
    %c0_i32_0 = arith.constant 0 : i32
    %c0_i32_1 = arith.constant 0 : i32
    return %c0_i32, %c0_i32_0 : i32, i32
  }
  func.func @transform_5(%arg0: i32) -> (i32, i32) {
    %c0_i32 = arith.constant 0 : i32
    %c0_i32_0 = arith.constant 0 : i32
    %c0_i32_1 = arith.constant 0 : i32
    return %c0_i32, %c0_i32_0 : i32, i32
  }
  func.func @transform_6(%arg0: i32) -> i32 {
    %c0_i32 = arith.constant 0 : i32
    %c0_i32_0 = arith.constant 0 : i32
    return %c0_i32 : i32
  }
  func.func @transform_7(%arg0: i32) -> (i32, i32) {
    %c0_i32 = arith.constant 0 : i32
    %c0_i32_0 = arith.constant 0 : i32
    return %c0_i32, %arg0 : i32, i32
  }
}

</mosaic_0001>

<bundles_post_ra>
// kernel: tpu_custom_call.1
= control target key start
LH: loop header
LB: loop body
LE: loop exit
PB: predicated region body
PF: predicated region fallthrough
CT: control target
= control target key end

     0   :  { %v2699_v2 = vmov 1   ;;  %v2700_v3 = vmov 0   ;;  %s3844_s0 = inlined_call_operand.vmem [shape: f32[2,128], index: 0, kind: input, shape index: {}]   ;;  %s3845_s1 = inlined_call_operand.vmem [shape: bf16[256,2], index: 1, kind: input, shape index: {}]   ;;  %s3846_s2 = inlined_call_operand.vmem [shape: bf16[256,1], index: 2, kind: input, shape index: {}]   ;;  %s3847_s3 = inlined_call_operand.vmem [shape: bf16[256,256], index: 3, kind: input, shape index: {}]   ;;  %s3848_s4 = inlined_call_operand.vmem [shape: f32[256,1], index: 4, kind: input, shape index: {}]   ;;  %s3849_s5 = inlined_call_operand.vmem [shape: f32[256,1], index: 5, kind: input, shape index: {}]   ;;  %s3850_s6 = inlined_call_operand.<no memory space> [shape: f32[1], index: 6, kind: input, shape index: {}]   ;;  %s3851_s7 = inlined_call_operand.hbm [shape: f32[1,128], index: 7, kind: output, shape index: {}]  }
   0x1   :  { %v2746_v0 = vld [vmem:[%s3845_s1 + $0x8] sm:$0xf]  ;;  %v32_v1 = vld [vmem:[%s3845_s1] sm:$0xf]  ;;  %2603 = vset.pattern.permute.xlu0 %v2699_v2  ;;  %2602 = vset.pattern.permute.xlu1 %v2700_v3  ;;  %v35_v4 = vld [vmem:[%s3845_s1 + $0xc] sm:$0xf] }
   0x2   :  { %90 = vperm.xlu1 %2602, %v2746_v0   ;;  %492 = vperm.xlu0 %2603, %v32_v1   ;;  %v37_v5 = vld [vmem:[%s3845_s1 + $0x14] sm:$0xf]  ;;  %v39_v6 = vld [vmem:[%s3845_s1 + $0x1c] sm:$0xf]  ;;  %v41_v7 = vld [vmem:[%s3845_s1 + $0x24] sm:$0xf] }
   0x3   :  { %v43_v8 = vld [vmem:[%s3845_s1 + $0x2c] sm:$0xf]  ;;  %v48_v9 = vld [vmem:[%s3845_s1 + $0x40] sm:$0xf]  ;;  %v2775_v10 = vld [vmem:[%s3845_s1 + $0x34] sm:$0xf] }
   0x4   :  { %v50_v11 = vld [vmem:[%s3845_s1 + $0x48] sm:$0xf]  ;;  %v2783_v12 = vld [vmem:[%s3845_s1 + $0x3c] sm:$0xf]  ;;  %v53_v13 = vld [vmem:[%s3845_s1 + $0x54] sm:$0xf] }
   0x6   :  { %102 = vperm.xlu1 %2602, %v35_v4   ;;  %525 = vperm.xlu0 %2603, %v35_v4  }
   0xa   :  { %126 = vperm.xlu1 %2602, %v37_v5   ;;  %547 = vperm.xlu0 %2603, %v37_v5  }
   0xe   :  { %150 = vperm.xlu1 %2602, %v39_v6   ;;  %569 = vperm.xlu0 %2603, %v39_v6  }
  0x12   :  { %174 = vperm.xlu1 %2602, %v41_v7   ;;  %591 = vperm.xlu0 %2603, %v41_v7  }
  0x16   :  { %198 = vperm.xlu1 %2602, %v43_v8   ;;  %668 = vperm.xlu0 %2603, %v48_v9  }
  0x1a   :  { %222 = vperm.xlu1 %2602, %v2775_v10   ;;  %690 = vperm.xlu0 %2603, %v50_v11  }
  0x1b   :  { %13 = vsyncpa [#allocation4], 0  ;;  %v49_v14 = vld [vmem:[%s3845_s1 + $0x44] sm:$0xf]  ;;  %v55_v15 = vld [vmem:[%s3845_s1 + $0x5c] sm:$0xf] }
  0x1c   :  { %v51_v16 = vld [vmem:[%s3845_s1 + $0x4c] sm:$0xf]  ;;  %v57_v17 = vld [vmem:[%s3845_s1 + $0x64] sm:$0xf]  ;;  %v44_v19 = vld [vmem:[%s3845_s1 + $0x30] sm:$0xf] }
  0x1d   :  { %v59_v18 = vld [vmem:[%s3845_s1 + $0x6c] sm:$0xf]  ;;  %v46_v20 = vld [vmem:[%s3845_s1 + $0x38] sm:$0xf]  ;;  %v2814_v21 = vld [vmem:[%s3845_s1 + $0x74] sm:$0xf] }
  0x1e   :  { %246 = vperm.xlu1 %2602, %v2783_v12   ;;  %723 = vperm.xlu0 %2603, %v53_v13   ;;  %v2821_v22 = vld [vmem:[%s3845_s1 + $0x7c] sm:$0xf]  ;;  %v33_v23 = vld [vmem:[%s3845_s1 + $0x4] sm:$0xf]  ;;  %v36_v24 = vld [vmem:[%s3845_s1 + $0x10] sm:$0xf] }
  0x1f   :  { %v38_v25 = vld [vmem:[%s3845_s1 + $0x18] sm:$0xf]  ;;  %v40_v26 = vld [vmem:[%s3845_s1 + $0x20] sm:$0xf]  ;;  %v42_v27 = vld [vmem:[%s3845_s1 + $0x28] sm:$0xf] }
  0x20   :  { %v52_v28 = vld [vmem:[%s3845_s1 + $0x50] sm:$0xf]  ;;  %v935_v29 = vld [vmem:[%s3846_s2 + $0x44] sm:$0xf]  ;;  %v54_v30 = vld [vmem:[%s3845_s1 + $0x58] sm:$0xf] }
  0x21   :  { %v918_v31 = vld [vmem:[%s3846_s2] sm:$0xf]  ;;  %v2861_v33 = vld [vmem:[%s3845_s1 + $0x68] sm:$0xf]  ;;  %v2870_v35 = vld [vmem:[%s3845_s1 + $0x70] sm:$0xf] }
  0x22   :  { %270 = vperm.xlu1 %2602, %v49_v14   ;;  %745 = vperm.xlu0 %2603, %v55_v15   ;;  %v56_v32 = vld [vmem:[%s3845_s1 + $0x60] sm:$0xf]  ;;  %v936_v34 = vld [vmem:[%s3846_s2 + $0x48] sm:$0xf]  ;;  %v937_v36 = vld [vmem:[%s3846_s2 + $0x4c] sm:$0xf] }
  0x23   :  { %v2880_v37 = vld [vmem:[%s3845_s1 + $0x78] sm:$0xf]  ;;  %v921_v38 = vld [vmem:[%s3846_s2 + $0xc] sm:$0xf]  ;;  %v934_v39 = vld [vmem:[%s3846_s2 + $0x40] sm:$0xf] }
  0x24   :  { %v919_v40 = vld [vmem:[%s3846_s2 + $0x4] sm:$0xf]  ;;  %v920_v41 = vld [vmem:[%s3846_s2 + $0x8] sm:$0xf]  ;;  %v938_v44 = vld [vmem:[%s3846_s2 + $0x50] sm:$0xf] }
  0x25   :  { %v922_v45 = vld [vmem:[%s3846_s2 + $0x10] sm:$0xf]  ;;  %v939_v48 = vld [vmem:[%s3846_s2 + $0x54] sm:$0xf]  ;;  %v924_v49 = vld [vmem:[%s3846_s2 + $0x18] sm:$0xf] }
  0x26   :  { %294 = vperm.xlu1 %2602, %v51_v16   ;;  %767 = vperm.xlu0 %2603, %v57_v17   ;;  %v923_v52 = vld [vmem:[%s3846_s2 + $0x14] sm:$0xf]  ;;  %v927_v53 = vld [vmem:[%s3846_s2 + $0x24] sm:$0xf]  ;;  %v944_v56 = vld [vmem:[%s3846_s2 + $0x68] sm:$0xf] }
  0x27   :  { %v940_v59 = vld [vmem:[%s3846_s2 + $0x58] sm:$0xf]  ;;  %v929_v60 = vld [vmem:[%s3846_s2 + $0x2c] sm:$0xf]  ;;  %v941_v63 = vld [vmem:[%s3846_s2 + $0x5c] sm:$0xf] }
  0x28   :  { %v925_v5 = vld [vmem:[%s3846_s2 + $0x1c] sm:$0xf]  ;;  %v931_v6 = vld [vmem:[%s3846_s2 + $0x34] sm:$0xf]  ;;  %s2702_s19 = smov [#allocation3]  }
  0x29   :  { %s2412_s20 = sshll.u32 %s2702_s19, 4  ;;  %s2413_s20 = int_to_ptr.vmem [resolvable:$true] %s2412_s20 }
  0x2a   :  { %318 = vperm.xlu1 %2602, %v53_v13   ;;  %789 = vperm.xlu0 %2603, %v59_v18   ;;  %s2675_s21 = scalar_lea.vmem %s2413_s20, 16  ;;  %s2679_s22 = scalar_lea.vmem %s2413_s20, 32 }
  0x2b   :  { %p2676_p0 = scmp.ne.s32.totalorder %s2413_s20, %s2675_s21  ;;  %p2680_p1 = scmp.lt.s32.totalorder %s2413_s20, %s2413_s20 }
  0x2c   :  { %p2681_p2 = scmp.lt.s32.totalorder %s2679_s22, %s2675_s21 }
  0x2e   :  { %342 = vperm.xlu1 %2602, %v55_v15   ;;  %613 = vperm.xlu0 %2603, %v43_v8   ;;  %p2682_p3 = por %p2681_p2, %p2680_p1 }
  0x30   :  { %p2683_p4 = pnand %p2682_p3, %p2676_p0 }
  0x32   :  { %366 = vperm.xlu1 %2602, %v57_v17   ;;  %624 = vperm.xlu0 %2603, %v44_v19   ;;  %v942_v17 = vld [vmem:[%s3846_s2 + $0x60] sm:$0xf] }
  0x36   :  { %390 = vperm.xlu1 %2602, %v59_v18   ;;  %646 = vperm.xlu0 %2603, %v46_v20   ;;  %v1464_v18 = vld [vmem:[%s3848_s4 + $0x10] sm:$0xff] }
  0x3a   :  { %414 = vperm.xlu1 %2602, %v2814_v21   ;;  %2620 = vset.pattern.permute.xlu0 %v2700_v3 }
  0x3b   :  { %66 = vperm.xlu0 %2620, %v32_v1  }
  0x3e   :  { %438 = vperm.xlu1 %2602, %v2821_v22  }
  0x3f   :  { %78 = vperm.xlu0 %2620, %v33_v23  }
  0x42   :  { %2604 = vset.pattern.permute.xlu1 %v2699_v2 }
  0x43   :  { %503 = vperm.xlu1 %2604, %v33_v23   ;;  %114 = vperm.xlu0 %2620, %v36_v24   ;;  %v943_v23 = vld [vmem:[%s3846_s2 + $0x64] sm:$0xf] }
  0x47   :  { %514 = vperm.xlu1 %2604, %v2746_v0   ;;  %138 = vperm.xlu0 %2620, %v38_v25   ;;  %v946_v0 = vld [vmem:[%s3846_s2 + $0x70] sm:$0xf] }
  0x4b   :  { %536 = vperm.xlu1 %2604, %v36_v24   ;;  %162 = vperm.xlu0 %2620, %v40_v26   ;;  %v1466_v24 = vld [vmem:[%s3848_s4 + $0x20] sm:$0xff] }
  0x4f   :  { %558 = vperm.xlu1 %2604, %v38_v25   ;;  %186 = vperm.xlu0 %2620, %v42_v27  }
  0x53   :  { %580 = vperm.xlu1 %2604, %v40_v26   ;;  %210 = vperm.xlu0 %2620, %v44_v19  }
  0x57   :  { %602 = vperm.xlu1 %2604, %v42_v27   ;;  %234 = vperm.xlu0 %2620, %v46_v20   ;;  %v926_v27 = vld [vmem:[%s3846_s2 + $0x20] sm:$0xf] }
  0x5b   :  { %679 = vperm.xlu1 %2604, %v49_v14   ;;  %258 = vperm.xlu0 %2620, %v48_v9   ;;  %v932_v9 = vld [vmem:[%s3846_s2 + $0x38] sm:$0xf]  ;;  %v1462_v14 = vld [vmem:[%s3848_s4] sm:$0xff] }
  0x5f   :  { %701 = vperm.xlu1 %2604, %v51_v16   ;;  %282 = vperm.xlu0 %2620, %v50_v11  }
  0x63   :  { %2605 = vset.pattern.permute.xlu1 %v2700_v3  ;;  %306 = vperm.xlu0 %2620, %v52_v28  }
  0x64   :  { %1156 = vperm.xlu1 %2605, %v935_v29  }
  0x67   :  { %330 = vperm.xlu0 %2620, %v54_v30  }
  0x68   :  { %952 = vperm.xlu1 %2605, %v918_v31   ;;  %v1470_v31 = vld [vmem:[%s3848_s4 + $0x40] sm:$0xff] }
  0x6b   :  { %354 = vperm.xlu0 %2620, %v56_v32  }
  0x6c   :  { %2606 = vset.pattern.permute.xlu1 %v2699_v2 }
  0x6d   :  { %712 = vperm.xlu1 %2606, %v52_v28   ;;  %v1468_v28 = vld [vmem:[%s3848_s4 + $0x30] sm:$0xff] }
  0x6f   :  { %378 = vperm.xlu0 %2620, %v2861_v33  }
  0x71   :  { %2607 = vset.pattern.permute.xlu1 %v2700_v3 }
  0x72   :  { %1168 = vperm.xlu1 %2607, %v936_v34   ;;  %v1472_v34 = vld [vmem:[%s3848_s4 + $0x50] sm:$0xff] }
  0x73   :  { %402 = vperm.xlu0 %2620, %v2870_v35  }
  0x76   :  { %1180 = vperm.xlu1 %2607, %v937_v36  }
  0x77   :  { %426 = vperm.xlu0 %2620, %v2880_v37  }
  0x7a   :  { %988 = vperm.xlu1 %2607, %v921_v38  }
  0x7b   :  { %1144 = vperm.xlu0 %2620, %v934_v39   ;;  %v945_v39 = vld [vmem:[%s3846_s2 + $0x6c] sm:$0xf] }
  0x7e   :  { %2608 = vset.pattern.permute.xlu1 %v2699_v2 }
  0x7f   :  { %734 = vperm.xlu1 %2608, %v54_v30   ;;  %964 = vperm.xlu0 %2620, %v919_v40  }
  0x81   :  { %v2896_v42 = vpop.permute.xlu1 %90  ;;  %v2898_v43 = vpop.permute.xlu0 %492 }
  0x83   :  { %2609 = vset.pattern.permute.xlu1 %v2700_v3  ;;  %976 = vperm.xlu0 %2620, %v920_v41  }
  0x84   :  { %1192 = vperm.xlu1 %2609, %v938_v44  }
  0x85   :  { %v2907_v46 = vpop.permute.xlu1 %102  ;;  %v2909_v47 = vpop.permute.xlu0 %525 }
  0x87   :  { %1000 = vperm.xlu0 %2620, %v922_v45  }
  0x88   :  { %1204 = vperm.xlu1 %2609, %v939_v48   ;;  %v1478_v48 = vld [vmem:[%s3848_s4 + $0x80] sm:$0xff] }
  0x89   :  { %v2917_v50 = vpop.permute.xlu1 %126  ;;  %v2919_v51 = vpop.permute.xlu0 %547 }
  0x8b   :  { %1024 = vperm.xlu0 %2620, %v924_v49   ;;  %v928_v49 = vld [vmem:[%s3846_s2 + $0x28] sm:$0xf] }
  0x8c   :  { %1012 = vperm.xlu1 %2609, %v923_v52  }
  0x8d   :  { %v2927_v54 = vpop.permute.xlu1 %150  ;;  %v2929_v55 = vpop.permute.xlu0 %569 }
  0x8f   :  { %1060 = vperm.xlu0 %2620, %v927_v53  }
  0x90   :  { %2610 = vset.pattern.permute.xlu1 %v2699_v2 }
  0x91   :  { %v2935_v57 = vpop.permute.xlu1 %174  ;;  %756 = vperm.xlu1 %2610, %v56_v32   ;;  %v2937_v58 = vpop.permute.xlu0 %591 }
  0x93   :  { %1264 = vperm.xlu0 %2620, %v944_v56  }
  0x95   :  { %v2945_v61 = vpop.permute.xlu1 %198  ;;  %2611 = vset.pattern.permute.xlu1 %v2700_v3  ;;  %v2948_v62 = vpop.permute.xlu0 %668 }
  0x96   :  { %1216 = vperm.xlu1 %2611, %v940_v59  }
  0x97   :  { %1084 = vperm.xlu0 %2620, %v929_v60   ;;  %v1482_v60 = vld [vmem:[%s3848_s4 + $0xa0] sm:$0xff] }
  0x99   :  { %v2956_v1 = vpop.permute.xlu1 %222  ;;  %v2958_v4 = vpop.permute.xlu0 %690 }
  0x9a   :  { %3852 = vst [vmem:[#allocation6_spill] sm:$0xff] %v2956_v1  ;;  %1228 = vperm.xlu1 %2611, %v941_v63  }
  0x9b   :  { %1288 = vperm.xlu0 %2620, %v946_v0  }
  0x9d   :  { %v2966_v7 = vpop.permute.xlu1 %246  ;;  %v2968_v8 = vpop.permute.xlu0 %723 }
  0x9e   :  { %3853 = vst [vmem:[#allocation7_spill] sm:$0xff] %v2966_v7  ;;  %1036 = vperm.xlu1 %2611, %v925_v5   ;;  %v2136_v5 = vld [vmem:[%s3849_s5 + $0x8] sm:$0xff] }
  0x9f   :  { %1108 = vperm.xlu0 %2620, %v931_v6  }
  0xa1   :  { %v2973_v11 = vpop.permute.xlu1 %270  ;;  %v2975_v13 = vpop.permute.xlu0 %745 }
  0xa2   :  { %2612 = vset.pattern.permute.xlu1 %v2699_v2 }
  0xa3   :  { %778 = vperm.xlu1 %2612, %v2861_v33   ;;  %1120 = vperm.xlu0 %2620, %v932_v9  }
  0xa5   :  { %v2982_v15 = vpop.permute.xlu1 %294  ;;  %v2984_v16 = vpop.permute.xlu0 %767 }
  0xa7   :  { %2613 = vset.pattern.permute.xlu1 %v2700_v3  ;;  %1496 = vperm.xlu0 %2620, %v1462_v14   ;;  %v2138_v14 = vld [vmem:[%s3849_s5 + $0x18] sm:$0xff] }
  0xa8   :  { %1240 = vperm.xlu1 %2613, %v942_v17  }
  0xa9   :  { %v2993_v19 = vpop.permute.xlu1 %318  ;;  %v2995_v20 = vpop.permute.xlu0 %789 }
  0xab   :  { %1506 = vperm.xlu0 %2620, %v1464_v18  }
  0xac   :  { %1252 = vperm.xlu1 %2613, %v943_v23  }
  0xad   :  { %v3003_v25 = vpop.permute.xlu1 %342  ;;  %v3005_v26 = vpop.permute.xlu0 %613 }
  0xaf   :  { %1516 = vperm.xlu0 %2620, %v1466_v24  }
  0xb0   :  { %1048 = vperm.xlu1 %2613, %v926_v27   ;;  %v2142_v27 = vld [vmem:[%s3849_s5 + $0x38] sm:$0xff] }
  0xb1   :  { %v3013_v29 = vpop.permute.xlu1 %366  ;;  %v3015_v30 = vpop.permute.xlu0 %624 }
  0xb2   :  { %3854 = vst [vmem:[#allocation8_spill] sm:$0xff] %v3015_v30 }
  0xb3   :  { %1526 = vperm.xlu0 %2620, %v1468_v28   ;;  %v930_v28 = vld [vmem:[%s3846_s2 + $0x30] sm:$0xf] }
  0xb4   :  { %2614 = vset.pattern.permute.xlu1 %v2699_v2 }
  0xb5   :  { %v3021_v32 = vpop.permute.xlu1 %390  ;;  %800 = vperm.xlu1 %2614, %v2870_v35   ;;  %v3024_v33 = vpop.permute.xlu0 %646  ;;  %v1474_v35 = vld [vmem:[%s3848_s4 + $0x60] sm:$0xff] }
  0xb6   :  { %3855 = vst [vmem:[#allocation9_spill] sm:$0xff] %v3024_v33 }
  0xb7   :  { %1536 = vperm.xlu0 %2620, %v1470_v31   ;;  %v72_v31 = vlaneseq }
  0xb9   :  { %v3029_v36 = vpop.permute.xlu1 %414  ;;  %811 = vperm.xlu1 %2614, %v2814_v21   ;;  %v1476_v21 = vld [vmem:[%s3848_s4 + $0x70] sm:$0xff] }
  0xba   :  { %v3032_v38 = vpop.permute.xlu0 %66 }
  0xbb   :  { %1546 = vperm.xlu0 %2620, %v1472_v34   ;;  %v30_v34 = vld [vmem:[%s3844_s0] sm:$0x3] }
  0xbd   :  { %v3040_v40 = vpop.permute.xlu1 %438  ;;  %2615 = vset.pattern.permute.xlu1 %v2700_v3 }
  0xbe   :  { %3856 = vst [vmem:[#allocation10_spill] sm:$0xff] %v3040_v40  ;;  %1276 = vperm.xlu1 %2615, %v945_v39   ;;  %v3043_v41 = vpop.permute.xlu0 %78 }
  0xbf   :  { %1556 = vperm.xlu0 %2620, %v1474_v35   ;;  %v31_v35 = vpack.c.bf16 %v30_v34, %v30_v34 }
  0xc2   :  { %2616 = vset.pattern.permute.xlu1 %v2699_v2  ;;  %v3049_v44 = vpop.permute.xlu1 %503  ;;  %v3051_v45 = vpop.permute.xlu0 %114 }
  0xc3   :  { %635 = vperm.xlu1 %2616, %v2775_v10   ;;  %1566 = vperm.xlu0 %2620, %v1476_v21   ;;  %v1480_v10 = vld [vmem:[%s3848_s4 + $0x90] sm:$0xff]  ;;  %v948_v21 = vld [vmem:[%s3846_s2 + $0x78] sm:$0xf] }
  0xc6   :  { %v3060_v52 = vpop.permute.xlu1 %514  ;;  %v3062_v53 = vpop.permute.xlu0 %138 }
  0xc7   :  { %2617 = vset.pattern.permute.xlu1 %v2700_v3  ;;  %1576 = vperm.xlu0 %2620, %v1478_v48   ;;  %v73_v48 = vshrl.u32 %v72_v31, 7 }
  0xc8   :  { %1072 = vperm.xlu1 %2617, %v928_v49  }
  0xca   :  { %v3068_v56 = vpop.permute.xlu1 %536  ;;  %v3070_v59 = vpop.permute.xlu0 %162 }
  0xcb   :  { %1586 = vperm.xlu0 %2620, %v1480_v10   ;;  %v2701_v10 = vmov 839922192  }
  0xcc   :  { %2618 = vset.pattern.permute.xlu1 %v2699_v2 }
  0xcd   :  { %822 = vperm.xlu1 %2618, %v2880_v37   ;;  %v947_v37 = vld [vmem:[%s3846_s2 + $0x74] sm:$0xf] }
  0xce   :  { %v3077_v63 = vpop.permute.xlu1 %558  ;;  %v3079_v0 = vpop.permute.xlu0 %186 }
  0xcf   :  { %1596 = vperm.xlu0 %2620, %v1482_v60   ;;  %v70_v60 = vunpack.c.l.s4 %v2701_v10 }
  0xd1   :  { %833 = vperm.xlu1 %2618, %v2821_v22   ;;  %v2140_v22 = vld [vmem:[%s3849_s5 + $0x28] sm:$0xff]  ;;  %v71_v31 = vunpack.c.0.s8 %v70_v60 }
  0xd2   :  { %v3085_v6 = vpop.permute.xlu1 %580  ;;  %v3087_v9 = vpop.permute.xlu0 %210 }
  0xd3   :  { %3857 = vst [vmem:[#allocation11_spill] sm:$0xff] %v3087_v9  ;;  %2174 = vperm.xlu0 %2620, %v2136_v5   ;;  %v843_v5 = vshrl.u32 %v31_v35, 16 }
  0xd5   :  { %2619 = vset.pattern.permute.xlu1 %v2700_v3  ;;  %v844_v34 = vpack.i.b16 %v843_v5, %v843_v5  ;;  %v2150_v5 = vld [vmem:[%s3849_s5 + $0x78] sm:$0xff] }
  0xd6   :  { %1300 = vperm.xlu1 %2619, %v947_v37   ;;  %v3096_v17 = vpop.permute.xlu1 %602  ;;  %v3098_v18 = vpop.permute.xlu0 %234 }
  0xd7   :  { %3858 = vst [vmem:[#allocation12_spill] sm:$0xff] %v3098_v18  ;;  %2184 = vperm.xlu0 %2620, %v2138_v14   ;;  %v949_v14 = vld [vmem:[%s3846_s2 + $0x7c] sm:$0xf] }
  0xda   :  { %2621 = vset.pattern.permute.xlu1 %v2699_v2  ;;  %v680_v23 = vpop.permute.xlu1 %679  ;;  %v3104_v24 = vpop.permute.xlu0 %258 }
  0xdb   :  { %657 = vperm.xlu1 %2621, %v2783_v12   ;;  %2194 = vperm.xlu0 %2620, %v2140_v22   ;;  %v2144_v12 = vld [vmem:[%s3849_s5 + $0x48] sm:$0xff]  ;;  %v453_v22 = vsub.s32 0, %v73_v48 }
  0xdd   :  { %v849_v33 = vrot.slane %v844_v34, %v453_v22 }
  0xde   :  { %v3116_v2 = vpop.permute.xlu1 %701  ;;  %v3118_v39 = vpop.permute.xlu0 %282 }
  0xdf   :  { %2622 = vset.pattern.permute.xlu1 %v2700_v3  ;;  %2204 = vperm.xlu0 %2620, %v2142_v27   ;;  %v2146_v3 = vld [vmem:[%s3849_s5 + $0x58] sm:$0xff]  ;;  %v449_v27 = vpack.i.b16 %v31_v35, %v31_v35  ;;  %v3149_v35 = vsub.s32 %v71_v31, %v73_v48 }
  0xe0   :  { %1096 = vperm.xlu1 %2622, %v930_v28  }
  0xe1   :  { %v454_v7 = vrot.slane %v449_v27, %v453_v22  ;;  %v688_v27 = vrot.slane %v680_v23, %v3149_v35  ;;  %v99_v48 = vrot.slane %v2896_v42, %v3149_v35  ;;  %v3166_v22 = vcombine.low %v849_v33, %v849_v33  ;;  %v2152_v23 = vld [vmem:[%s3849_s5 + $0x88] sm:$0xff] }
  0xe2   :  { %v3127_v49 = vpop.permute.xlu0 %306  ;;  %v111_v31 = vrot.slane %v2907_v46, %v3149_v35  ;;  %v534_v34 = vrot.slane %v2909_v47, %v3149_v35  ;;  %v501_v42 = vrot.slane %v2898_v43, %v3149_v35  ;;  %v75_v33 = vrot.slane %v3032_v38, %v3149_v35  ;;  %v1465_v46 = vld [vmem:[%s3848_s4 + $0x18] sm:$0xff] }
  0xe3   :  { %v3129_v37 = vpop.permute.xlu1 %1156  ;;  %2214 = vperm.xlu0 %2620, %v2144_v12   ;;  %v2148_v12 = vld [vmem:[%s3849_s5 + $0x68] sm:$0xff]  ;;  %v871_v47 = vmul.bf16 %v3166_v22, %v688_v27  ;;  %v291_v30 = vrot.slane %v3118_v39, %v3149_v35 }
  0xe4   :  { %1312 = vperm.xlu1 %2622, %v948_v21   ;;  %v933_v21 = vld [vmem:[%s3846_s2 + $0x3c] sm:$0xf]  ;;  %v3198_v38 = vmul.bf16 %v3166_v22, %v534_v34  ;;  %v854_v34 = vmul.bf16 %v3166_v22, %v501_v42  ;;  %v1467_v39 = vld [vmem:[%s3848_s4 + $0x28] sm:$0xff] }
  0xe6   :  { %v3137_v28 = vpop.permute.xlu0 %330 }
  0xe7   :  { %v3139_v10 = vpop.permute.xlu1 %952  ;;  %2224 = vperm.xlu0 %2620, %v2146_v3   ;;  %v1463_v3 = vld [vmem:[%s3848_s4 + $0x8] sm:$0xff] }
  0xe8   :  { %1324 = vperm.xlu1 %2622, %v949_v14   ;;  %v3159_v14 = vcombine.low %v454_v7, %v454_v7  ;;  %v279_v7 = vrot.slane %v2973_v11, %v3149_v35  ;;  %v710_v11 = vrot.slane %v3116_v2, %v3149_v35  ;;  %v303_v2 = vrot.slane %v2982_v15, %v3149_v35 }
  0xea   :  { %v3147_v40 = vpop.permute.xlu0 %354  ;;  %v3195_v43 = vmul.bf16 %v3159_v14, %v111_v31  ;;  %v476_v27 = vmul.bf16 %v3159_v14, %v279_v7  ;;  %v2153_v31 = vld [vmem:[%s3849_s5 + $0x90] sm:$0xff]  ;;  %v699_v7 = vrot.slane %v2958_v4, %v3149_v35  ;;  %v459_v15 = vmul.bf16 %v3159_v14, %v75_v33 }
  0xeb   :  { %2234 = vperm.xlu0 %2620, %v2148_v12   ;;  %v873_v42 = vmul.bf16 %v3166_v22, %v710_v11  ;;  %v477_v11 = vmul.bf16 %v3159_v14, %v291_v30  ;;  %v961_v30 = vrot.slane %v3139_v10, %v3149_v35  ;;  %v315_v10 = vrot.slane %v3127_v49, %v3149_v35 }
  0xec   :  { %1132 = vperm.xlu1 %2622, %v933_v21   ;;  %v3151_v60 = vpop.permute.xlu1 %712  ;;  %v903_v9 = vadd.bf16 %v871_v47, %v476_v27  ;;  %v478_v47 = vmul.bf16 %v3159_v14, %v303_v2  ;;  %v886_v33 = vadd.bf16 %v854_v34, %v459_v15  ;;  %v1469_v2 = vld [vmem:[%s3848_s4 + $0x38] sm:$0xff]  ;;  %v523_v34 = vrot.slane %v3060_v52, %v3149_v35 }
  0xed   :  { %v732_v52 = vrot.slane %v2968_v8, %v3149_v35 }
  0xee   :  { %v3162_v18 = vpop.permute.xlu0 %378  ;;  %v856_v8 = vmul.bf16 %v3166_v22, %v523_v34 }
  0xef   :  { %2244 = vperm.xlu0 %2620, %v2150_v5   ;;  %v3192_v5 = vmul.bf16 %v3159_v14, %v99_v48  ;;  %v1165_v48 = vrot.slane %v3129_v37, %v3149_v35  ;;  %v87_v37 = vrot.slane %v3043_v41, %v3149_v35  ;;  %v889_v41 = vadd.bf16 %v3198_v38, %v3195_v43  ;;  %v2628_v43 = vld [vmem:[%s3847_s3 + $0x84] ss:$8 sps:$4 sm:$0xff]  }
  0xf0   :  { %1501 = vperm.xlu1 %2622, %v1463_v3   ;;  %v267_v3 = vrot.slane %v3104_v24, %v3149_v35  ;;  %v677_v24 = vrot.slane %v2948_v62, %v3149_v35  ;;  %2006 = vmatprep.mubr.bf16.mxu1 %v2628_v43 }
  0xf1   :  { %v3181_v12 = vpop.permute.xlu1 %1168  ;;  %v1351_v27 = vadd.bf16 %v1165_v48, %v903_v9  ;;  %v460_v48 = vmul.bf16 %v3159_v14, %v87_v37  ;;  %v721_v37 = vrot.slane %v3151_v60, %v3149_v35  ;;  %v327_v60 = vrot.slane %v2993_v19, %v3149_v35 }
  0xf2   :  { %v3189_v21 = vpop.permute.xlu0 %402  ;;  %v475_v1 = vmul.bf16 %v3159_v14, %v267_v3  ;;  %v2154_v3 = vld [vmem:[%s3849_s5 + $0x98] sm:$0xff]  ;;  %v870_v38 = vmul.bf16 %v3166_v22, %v677_v24  ;;  %v905_v24 = vadd.bf16 %v873_v42, %v478_v47  ;;  %v1334_v47 = vadd.bf16 %v961_v30, %v886_v33 }
  0xf3   :  { %2254 = vperm.xlu0 %2620, %v2152_v23   ;;  %v1383_v42 = vmul.bf16 1045249613, %v1351_v27  ;;  %v545_v33 = vrot.slane %v3068_v56, %v3149_v35  ;;  %v874_v19 = vmul.bf16 %v3166_v22, %v721_v37  ;;  %v1473_v56 = vld [vmem:[%s3848_s4 + $0x58] sm:$0xff] }
  0xf4   :  { %1511 = vperm.xlu1 %2622, %v1465_v46   ;;  %v512_v46 = vrot.slane %v3049_v44, %v3149_v35  ;;  %v2625_v44 = vld [vmem:[%s3847_s3 + $0x4] ss:$8 sps:$4 sm:$0xff]   ;;  %v1366_v34 = vmul.bf16 1045249613, %v1334_v47 }
  0xf5   :  { %v1181_v23 = vpop.permute.xlu1 %1180  ;;  %1942 = vmatprep.mubr.bf16.mxu0 %v2625_v44 }
  0xf6   :  { %v3226_v62 = vpop.permute.xlu0 %426  ;;  %v1189_v4 = vrot.slane %v1181_v23, %v3149_v35  ;;  %v855_v23 = vmul.bf16 %v3166_v22, %v512_v46 }
  0xf7   :  { %3859 = vst [vmem:[#allocation13_spill] sm:$0xff] %v3226_v62  ;;  %2259 = vperm.xlu0 %2620, %v2153_v31   ;;  %v872_v31 = vmul.bf16 %v3166_v22, %v699_v7  ;;  %v902_v7 = vadd.bf16 %v870_v38, %v475_v1 }
  0xf8   :  { %1521 = vperm.xlu1 %2622, %v1467_v39   ;;  %v1177_v39 = vrot.slane %v3181_v12, %v3149_v35  ;;  %v1353_v44 = vadd.bf16 %v1189_v4, %v905_v24  ;;  %v2155_v12 = vld [vmem:[%s3849_s5 + $0xa0] sm:$0xff]  ;;  %v123_v4 = vrot.slane %v3051_v45, %v3149_v35  ;;  %v887_v38 = vadd.bf16 %v855_v23, %v460_v48  ;;  %v2156_v45 = vld [vmem:[%s3849_s5 + $0xa8] sm:$0xff] }
  0xf9   :  { %v989_v9 = vpop.permute.xlu1 %988  ;;  %v904_v46 = vadd.bf16 %v872_v31, %v477_v11  ;;  %v1415_v48 = vmax.bf16 %v1383_v42, %v1351_v27 }
  0xfa   :  { %v1145_v62 = vpop.permute.xlu0 %1144  ;;  %v997_v1 = vrot.slane %v989_v9, %v3149_v35  ;;  %v479_v9 = vmul.bf16 %v3159_v14, %v315_v10  ;;  %v480_v10 = vmul.bf16 %v3159_v14, %v327_v60  ;;  %v2157_v60 = vld [vmem:[%s3849_s5 + $0xb0] sm:$0xff] }
  0xfb   :  { %v1153_v15 = vrot.slane %v1145_v62, %v3149_v35  ;;  %2264 = vperm.xlu0 %2620, %v2154_v3   ;;  %v1471_v62 = vld [vmem:[%s3848_s4 + $0x48] sm:$0xff]  ;;  %v1352_v11 = vadd.bf16 %v1177_v39, %v904_v46 }
  0xfc   :  { %1531 = vperm.xlu1 %2622, %v1469_v2   ;;  %v1385_v2 = vmul.bf16 1045249613, %v1353_v44  ;;  %v1337_v23 = vadd.bf16 %v997_v1, %v889_v41  ;;  %v858_v1 = vmul.bf16 %v3166_v22, %v545_v33 }
  0xfd   :  { %v1350_v49 = vadd.bf16 %v1153_v15, %v902_v7  ;;  %v875_v7 = vmul.bf16 %v3166_v22, %v732_v52  ;;  %v463_v15 = vmul.bf16 %v3159_v14, %v123_v4  ;;  %v1384_v37 = vmul.bf16 1045249613, %v1352_v11 }
  0xfe   :  { %v3278_v3 = vpop.permute.xlu1 %734  ;;  %v965_v43 = vpop.permute.xlu0 %964  ;;  %v1369_v4 = vmul.bf16 1045249613, %v1337_v23 }
  0xff   :  { %v1382_v31 = vmul.bf16 1045249613, %v1350_v49  ;;  %v973_v30 = vrot.slane %v965_v43, %v3149_v35  ;;  %2269 = vperm.xlu0 %2620, %v2155_v12   ;;  %v906_v43 = vadd.bf16 %v874_v19, %v479_v9 }
 0x100   :  { %1541 = vperm.xlu1 %2622, %v1471_v62   ;;  %v888_v62 = vadd.bf16 %v856_v8, %v3192_v5  ;;  %v1475_v5 = vld [vmem:[%s3848_s4 + $0x68] sm:$0xff]  ;;  %v1398_v8 = vmax.bf16 %v1366_v34, %v1334_v47  ;;  %v907_v34 = vadd.bf16 %v875_v7, %v480_v10 }
 0x101   :  { %v1335_v39 = vadd.bf16 %v973_v30, %v887_v38  ;;  %v1414_v24 = vmax.bf16 %v1382_v31, %v1350_v49  ;;  %v1417_v49 = vmax.bf16 %v1385_v2, %v1353_v44  ;;  %v3860_v44 = vrot.slane %v2917_v50, %v3149_v35 }
 0x102   :  { %v977_v46 = vpop.permute.xlu0 %976  ;;  %v1416_v30 = vmax.bf16 %v1384_v37, %v1352_v11  ;;  %v3861_v2 = vrot.slane %v2919_v51, %v3149_v35  ;;  %v2158_v11 = vld [vmem:[%s3849_s5 + $0xb8] sm:$0xff]  ;;  %v1401_v37 = vmax.bf16 %v1369_v4, %v1337_v23  ;;  %v2159_v23 = vld [vmem:[%s3849_s5 + $0xc0] sm:$0xff] }
 0x103   :  { %v1367_v12 = vmul.bf16 1045249613, %v1335_v39  ;;  %v985_v41 = vrot.slane %v977_v46, %v3149_v35  ;;  %v1193_v27 = vpop.permute.xlu1 %1192  ;;  %2274 = vperm.xlu0 %2620, %v2156_v45   ;;  %v2462_v42 = vcombine.low %v1414_v24, %v1415_v48  ;;  %v464_v33 = vmul.bf16 %v3159_v14, %v3860_v44 }
 0x104   :  { %v1201_v52 = vrot.slane %v1193_v27, %v3149_v35  ;;  %1551 = vperm.xlu1 %2622, %v1473_v56   ;;  %v859_v45 = vmul.bf16 %v3166_v22, %v3861_v2  ;;  %v2463_v46 = vcombine.low %v1416_v30, %v1417_v49  ;;  %v339_v49 = vrot.slane %v3137_v28, %v3149_v35 }
 0x105   :  { %v1336_v38 = vadd.bf16 %v985_v41, %v888_v62  ;;  %2470 = vmatprep.subr.bf16.mxu0 %v2462_v42  ;;  %2582 = vmatprep.subr.bf16.mxu1 %v2462_v42  ;;  %v1399_v31 = vmax.bf16 %v1367_v12, %v1335_v39  ;;  %v890_v39 = vadd.bf16 %v858_v1, %v463_v15  ;;  %v1477_v12 = vld [vmem:[%s3848_s4 + $0x78] sm:$0xff] }
 0x106   :  { %v1354_v9 = vadd.bf16 %v1201_v52, %v906_v43  ;;  %v1001_v19 = vpop.permute.xlu0 %1000  ;;  %v891_v42 = vadd.bf16 %v859_v45, %v464_v33  ;;  %v743_v43 = vrot.slane %v3278_v3, %v3149_v35  ;;  %v1479_v52 = vld [vmem:[%s3848_s4 + $0x88] sm:$0xff]  ;;  %v351_v33 = vrot.slane %v3003_v25, %v3149_v35 }
 0x107   :  { %v1368_v48 = vmul.bf16 1045249613, %v1336_v38  ;;  %v1009_v56 = vrot.slane %v1001_v19, %v3149_v35  ;;  %v1205_v24 = vpop.permute.xlu1 %1204  ;;  %2279 = vperm.xlu0 %2620, %v2157_v60   ;;  %v2454_v47 = vcombine.low %v1398_v8, %v1399_v31  ;;  %v754_v8 = vrot.slane %v2975_v13, %v3149_v35  ;;  %v2160_v3 = vld [vmem:[%s3849_s5 + $0xc8] sm:$0xff]  ;;  %v1481_v19 = vld [vmem:[%s3848_s4 + $0x98] sm:$0xff] }
 0x108   :  { %v1213_v50 = vrot.slane %v1205_v24, %v3149_v35  ;;  %1561 = vperm.xlu1 %2622, %v1475_v5   ;;  %v1386_v62 = vmul.bf16 1045249613, %v1354_v9  ;;  %v147_v30 = vrot.slane %v3062_v53, %v3149_v35  ;;  %v481_v13 = vmul.bf16 %v3159_v14, %v339_v49 }
 0x109   :  { %v1400_v51 = vmax.bf16 %v1368_v48, %v1336_v38  ;;  %2471 = vmatpush3.bf16.msra.mxu0 %v2454_v47  ;;  %2590 = vmatpush3.bf16.msra.mxu1 %v2454_v47  ;;  %v1338_v41 = vadd.bf16 %v1009_v56, %v890_v39  ;;  %v876_v2 = vmul.bf16 %v3166_v22, %v743_v43  ;;  %v2163_v43 = vld [vmem:[%s3849_s5 + $0xe0] sm:$0xff] }
 0x10a   :  { %v1355_v15 = vadd.bf16 %v1213_v50, %v907_v34  ;;  %2472 = vmatprep.subr.bf16.mxu0 %v2463_v46  ;;  %2583 = vmatprep.subr.bf16.mxu1 %v2463_v46  ;;  %v1418_v60 = vmax.bf16 %v1386_v62, %v1354_v9  ;;  %v567_v9 = vrot.slane %v3077_v63, %v3149_v35  ;;  %v1025_v53 = vpop.permute.xlu0 %1024  ;;  %v2161_v63 = vld [vmem:[%s3849_s5 + $0xd0] sm:$0xff] }
 0x10b   :  { %v1013_v7 = vpop.permute.xlu1 %1012  ;;  %2284 = vperm.xlu0 %2620, %v2158_v11   ;;  %v2455_v10 = vcombine.low %v1400_v51, %v1401_v37  ;;  %v1370_v4 = vmul.bf16 1045249613, %v1338_v41  ;;  %v159_v25 = vrot.slane %v2927_v54, %v3149_v35  ;;  %v578_v24 = vrot.slane %v2929_v55, %v3149_v35  ;;  %v2135_v54 = vld [vmem:[%s3849_s5] sm:$0xff] }
 0x10c   :  { %v1387_v27 = vmul.bf16 1045249613, %v1355_v15  ;;  %v1021_v1 = vrot.slane %v1013_v7, %v3149_v35  ;;  %1571 = vperm.xlu1 %2622, %v1477_v12   ;;  %v877_v47 = vmul.bf16 %v3166_v22, %v754_v8  ;;  %v465_v39 = vmul.bf16 %v3159_v14, %v147_v30  ;;  %v2162_v12 = vld [vmem:[%s3849_s5 + $0xd8] sm:$0xff]  ;;  %v2165_v30 = vld [vmem:[%s3849_s5 + $0xf0] sm:$0xff] }
 0x10d   :  { %2473 = vmatpush3.bf16.msra.mxu0 %v2455_v10  ;;  %2591 = vmatpush3.bf16.msra.mxu1 %v2455_v10  ;;  %v1402_v45 = vmax.bf16 %v1370_v4, %v1338_v41  ;;  %v860_v34 = vmul.bf16 %v3166_v22, %v567_v9  ;;  %v482_v46 = vmul.bf16 %v3159_v14, %v351_v33  ;;  %v2141_v9 = vld [vmem:[%s3849_s5 + $0x30] sm:$0xff] }
 0x10e   :  { %v1419_v38 = vmax.bf16 %v1387_v27, %v1355_v15  ;;  %v1339_v5 = vadd.bf16 %v1021_v1, %v891_v42  ;;  %v908_v11 = vadd.bf16 %v876_v2, %v481_v13  ;;  %v1033_v55 = vrot.slane %v1025_v53, %v3149_v35  ;;  %v2137_v15 = vld [vmem:[%s3849_s5 + $0x10] sm:$0xff] }
 0x10f   :  { %2289 = vperm.xlu0 %2620, %v2159_v23   ;;  %v892_v62 = vadd.bf16 %v860_v34, %v465_v39  ;;  %v466_v7 = vmul.bf16 %v3159_v14, %v159_v25  ;;  %v861_v10 = vmul.bf16 %v3166_v22, %v578_v24  ;;  %v909_v27 = vadd.bf16 %v877_v47, %v482_v46 }
 0x110   :  { %v1371_v31 = vmul.bf16 1045249613, %v1339_v5  ;;  %1581 = vperm.xlu1 %2622, %v1479_v52   ;;  %v3334_v28 = vpop.permute.xlu1 %756  ;;  %v2464_v44 = vcombine.low %v1418_v60, %v1419_v38  ;;  %v2139_v60 = vld [vmem:[%s3849_s5 + $0x20] sm:$0xff]  ;;  %v183_v13 = vrot.slane %v2935_v57, %v3149_v35  ;;  %v776_v25 = vrot.slane %v2984_v16, %v3149_v35 }
 0x111   :  { %v1340_v1 = vadd.bf16 %v1033_v55, %v892_v62  ;;  %v893_v38 = vadd.bf16 %v861_v10, %v466_v7  ;;  %v375_v53 = vrot.slane %v3013_v29, %v3149_v35  ;;  %v171_v34 = vrot.slane %v3070_v59, %v3149_v35  ;;  %v2145_v55 = vld [vmem:[%s3849_s5 + $0x50] sm:$0xff]  ;;  %v2147_v10 = vld [vmem:[%s3849_s5 + $0x60] sm:$0xff] }
 0x112   :  { %v1403_v48 = vmax.bf16 %v1371_v31, %v1339_v5  ;;  %2474 = vmatprep.subr.bf16.mxu0 %v2464_v44  ;;  %2584 = vmatprep.subr.bf16.mxu1 %v2464_v44  ;;  %v765_v31 = vrot.slane %v3334_v28, %v3149_v35  ;;  %v879_v29 = vmul.bf16 %v3166_v22, %v776_v25 }
 0x113   :  { %2294 = vperm.xlu0 %2620, %v2160_v3   ;;  %v1372_v8 = vmul.bf16 1045249613, %v1340_v1  ;;  %v484_v39 = vmul.bf16 %v3159_v14, %v375_v53  ;;  %v589_v46 = vrot.slane %v3085_v6, %v3149_v35 }
 0x114   :  { %1591 = vperm.xlu1 %2622, %v1481_v19   ;;  %v2456_v56 = vcombine.low %v1402_v45, %v1403_v48  ;;  %v363_v19 = vrot.slane %v3147_v40, %v3149_v35  ;;  %v600_v48 = vrot.slane %v2937_v58, %v3149_v35  ;;  %v2143_v40 = vld [vmem:[%s3849_s5 + $0x40] sm:$0xff]  ;;  %v468_v58 = vmul.bf16 %v3159_v14, %v183_v13 }
 0x115   :  { %v1217_v50 = vpop.permute.xlu1 %1216  ;;  %v911_v6 = vadd.bf16 %v879_v29, %v484_v39  ;;  %v798_v13 = vrot.slane %v2995_v20, %v3149_v35  ;;  %v1483_v20 = vld [vmem:[%s3848_s4 + $0xa8] sm:$0xff] }
 0x116   :  { %v1225_v37 = vrot.slane %v1217_v50, %v3149_v35  ;;  %2475 = vmatpush3.bf16.msra.mxu0 %v2456_v56  ;;  %2592 = vmatpush3.bf16.msra.mxu1 %v2456_v56  ;;  %v1404_v56 = vmax.bf16 %v1372_v8, %v1340_v1  ;;  %v483_v24 = vmul.bf16 %v3159_v14, %v363_v19  ;;  %v1061_v50 = vpop.permute.xlu0 %1060  ;;  %v2151_v19 = vld [vmem:[%s3849_s5 + $0x80] sm:$0xff] }
 0x117   :  { %2299 = vperm.xlu0 %2620, %v2161_v63   ;;  %v878_v63 = vmul.bf16 %v3166_v22, %v765_v31  ;;  %v863_v47 = vmul.bf16 %v3166_v22, %v600_v48 }
 0x118   :  { %v1356_v51 = vadd.bf16 %v1225_v37, %v908_v11  ;;  %2169 = vperm.xlu1 %2622, %v2135_v54  }
 0x119   :  { %v1229_v41 = vpop.permute.xlu1 %1228  ;;  %v910_v11 = vadd.bf16 %v878_v63, %v483_v24  ;;  %v895_v62 = vadd.bf16 %v863_v47, %v468_v58  ;;  %v207_v24 = vrot.slane %v2945_v61, %v3149_v35  ;;  %v1484_v47 = vld [vmem:[%s3848_s4 + $0xb0] sm:$0xff] }
 0x11a   :  { %v1237_v42 = vrot.slane %v1229_v41, %v3149_v35  ;;  %v1388_v23 = vmul.bf16 1045249613, %v1356_v51  ;;  %v467_v41 = vmul.bf16 %v3159_v14, %v171_v34  ;;  %v1265_v48 = vpop.permute.xlu0 %1264 }
 0x11b   :  { %2304 = vperm.xlu0 %2620, %v2162_v12  }
 0x11c   :  { %v1357_v49 = vadd.bf16 %v1237_v42, %v909_v27  ;;  %2179 = vperm.xlu1 %2622, %v2137_v15   ;;  %v1420_v44 = vmax.bf16 %v1388_v23, %v1356_v51  ;;  %v1069_v51 = vrot.slane %v1061_v50, %v3149_v35  ;;  %v862_v15 = vmul.bf16 %v3166_v22, %v589_v46 }
 0x11d   :  { %v1037_v52 = vpop.permute.xlu1 %1036 }
 0x11e   :  { %v1389_v4 = vmul.bf16 1045249613, %v1357_v49  ;;  %v1045_v5 = vrot.slane %v1037_v52, %v3149_v35  ;;  %v1343_v27 = vadd.bf16 %v1069_v51, %v895_v62  ;;  %v894_v52 = vadd.bf16 %v862_v15, %v467_v41  ;;  %v1085_v50 = vpop.permute.xlu0 %1084  ;;  %v1486_v15 = vld [vmem:[%s3848_s4 + $0xc0] sm:$0xff] }
 0x11f   :  { %2309 = vperm.xlu0 %2620, %v2163_v43  }
 0x120   :  { %v1421_v3 = vmax.bf16 %v1389_v4, %v1357_v49  ;;  %v1341_v33 = vadd.bf16 %v1045_v5, %v893_v38  ;;  %2189 = vperm.xlu1 %2622, %v2139_v60   ;;  %v387_v4 = vrot.slane %v3162_v18, %v3149_v35  ;;  %v2149_v38 = vld [vmem:[%s3849_s5 + $0x70] sm:$0xff]  ;;  %v1375_v5 = vmul.bf16 1045249613, %v1343_v27 }
 0x121   :  { %v399_v18 = vrot.slane %v3021_v32, %v3149_v35  ;;  %v881_v32 = vmul.bf16 %v3166_v22, %v798_v13 }
 0x122   :  { %v1373_v2 = vmul.bf16 1045249613, %v1341_v33  ;;  %v779_v28 = vpop.permute.xlu1 %778  ;;  %v2465_v45 = vcombine.low %v1420_v44, %v1421_v3 }
 0x123   :  { %2319 = vperm.xlu0 %2620, %v2165_v30   ;;  %v787_v49 = vrot.slane %v779_v28, %v3149_v35  ;;  %v1407_v28 = vmax.bf16 %v1375_v5, %v1343_v27  ;;  %v486_v63 = vmul.bf16 %v3159_v14, %v399_v18  ;;  %v1488_v5 = vld [vmem:[%s3848_s4 + $0xd0] sm:$0xff]  ;;  %v1489_v18 = vld [vmem:[%s3848_s4 + $0xd8] sm:$0xff] }
 0x124   :  { %v1405_v57 = vmax.bf16 %v1373_v2, %v1341_v33  ;;  %2199 = vperm.xlu1 %2622, %v2141_v9   ;;  %2476 = vmatprep.subr.bf16.mxu0 %v2465_v45  ;;  %v485_v2 = vmul.bf16 %v3159_v14, %v387_v4 }
 0x125   :  { %2585 = vmatprep.subr.bf16.mxu1 %v2465_v45  ;;  %v880_v3 = vmul.bf16 %v3166_v22, %v787_v49  ;;  %v913_v29 = vadd.bf16 %v881_v32, %v486_v63  ;;  %v411_v49 = vrot.slane %v3189_v21, %v3149_v35  ;;  %v423_v21 = vrot.slane %v3029_v36, %v3149_v35 }
 0x126   :  { %v2457_v16 = vcombine.low %v1404_v56, %v1405_v57  ;;  %v1273_v57 = vrot.slane %v1265_v48, %v3149_v35 }
 0x127   :  { %v1241_v54 = vpop.permute.xlu1 %1240  ;;  %v912_v25 = vadd.bf16 %v880_v3, %v485_v2  ;;  %v488_v36 = vmul.bf16 %v3159_v14, %v423_v21 }
 0x128   :  { %v1249_v37 = vrot.slane %v1241_v54, %v3149_v35  ;;  %2209 = vperm.xlu1 %2622, %v2143_v40   ;;  %2477 = vmatpush3.bf16.msra.mxu0 %v2457_v16  ;;  %v622_v40 = vrot.slane %v3005_v26, %v3149_v35  ;;  %v195_v54 = vrot.slane %v3079_v0, %v3149_v35 }
 0x129   :  { %2593 = vmatpush3.bf16.msra.mxu1 %v2457_v16  ;;  %v1360_v58 = vadd.bf16 %v1273_v57, %v912_v25  ;;  %v611_v26 = vrot.slane %v3096_v17, %v3149_v35 }
 0x12a   :  { %v1358_v12 = vadd.bf16 %v1249_v37, %v910_v11  ;;  %v865_v34 = vmul.bf16 %v3166_v22, %v622_v40  ;;  %v470_v11 = vmul.bf16 %v3159_v14, %v207_v24  ;;  %v1485_v37 = vld [vmem:[%s3848_s4 + $0xb8] sm:$0xff]  ;;  %v3863_v40 = vld [vmem:[#allocation11_spill] sm:$0xff] }
 0x12b   :  { %v1253_v59 = vpop.permute.xlu1 %1252  ;;  %v1392_v61 = vmul.bf16 1045249613, %v1360_v58  ;;  %v864_v0 = vmul.bf16 %v3166_v22, %v611_v26 }
 0x12c   :  { %v1261_v7 = vrot.slane %v1253_v59, %v3149_v35  ;;  %2219 = vperm.xlu1 %2622, %v2145_v55   ;;  %v1390_v42 = vmul.bf16 1045249613, %v1358_v12  ;;  %v1093_v55 = vrot.slane %v1085_v50, %v3149_v35  ;;  %v897_v62 = vadd.bf16 %v865_v34, %v470_v11 }
 0x12d   :  { %v469_v59 = vmul.bf16 %v3159_v14, %v195_v54  ;;  %v1424_v17 = vmax.bf16 %v1392_v61, %v1360_v58  ;;  %v219_v58 = vrot.slane %v3863_v40, %v3149_v35 }
 0x12e   :  { %v1359_v1 = vadd.bf16 %v1261_v7, %v911_v6  ;;  %v1422_v8 = vmax.bf16 %v1390_v42, %v1358_v12  ;;  %v1345_v6 = vadd.bf16 %v1093_v55, %v897_v62  ;;  %v1492_v62 = vld [vmem:[%s3848_s4 + $0xf0] sm:$0xff] }
 0x12f   :  { %v1049_v23 = vpop.permute.xlu1 %1048  ;;  %v896_v42 = vadd.bf16 %v864_v0, %v469_v59  ;;  %v471_v61 = vmul.bf16 %v3159_v14, %v219_v58 }
 0x130   :  { %v1391_v43 = vmul.bf16 1045249613, %v1359_v1  ;;  %v1057_v60 = vrot.slane %v1049_v23, %v3149_v35  ;;  %2229 = vperm.xlu1 %2622, %v2147_v10   ;;  %v1487_v23 = vld [vmem:[%s3848_s4 + $0xc8] sm:$0xff] }
 0x132   :  { %v1423_v31 = vmax.bf16 %v1391_v43, %v1359_v1  ;;  %v1342_v44 = vadd.bf16 %v1057_v60, %v894_v52  ;;  %v1377_v43 = vmul.bf16 1045249613, %v1345_v6 }
 0x134   :  { %v1374_v33 = vmul.bf16 1045249613, %v1342_v44  ;;  %2239 = vperm.xlu1 %2622, %v2149_v38   ;;  %v801_v30 = vpop.permute.xlu1 %800  ;;  %v2466_v9 = vcombine.low %v1422_v8, %v1423_v31  ;;  %v487_v8 = vmul.bf16 %v3159_v14, %v411_v49  ;;  %v1409_v31 = vmax.bf16 %v1377_v43, %v1345_v6  ;;  %v3868_v49 = vld [vmem:[#allocation10_spill] sm:$0xff] }
 0x135   :  { %v809_v27 = vrot.slane %v801_v30, %v3149_v35  ;;  %v447_v43 = vrot.slane %v3868_v49, %v3149_v35  ;;  %v2652_v49 = vld [vmem:[%s3847_s3 + $0xc0] ss:$8 sps:$4 sm:$0xff]  }
 0x136   :  { %v1406_v45 = vmax.bf16 %v1374_v33, %v1342_v44  ;;  %2478 = vmatprep.subr.bf16.mxu0 %v2466_v9  ;;  %2586 = vmatprep.subr.bf16.mxu1 %v2466_v9  ;;  %v1289_v33 = vpop.permute.xlu0 %1288 }
 0x137   :  { %v882_v60 = vmul.bf16 %v3166_v22, %v809_v27 }
 0x138   :  { %2249 = vperm.xlu1 %2622, %v2151_v19   ;;  %v3440_v53 = vpop.permute.xlu1 %811  ;;  %v2458_v56 = vcombine.low %v1406_v45, %v1407_v28  ;;  %v1297_v19 = vrot.slane %v1289_v33, %v3149_v35  ;;  %v3862_v45 = vld [vmem:[#allocation6_spill] sm:$0xff] }
 0x139   :  { %v820_v44 = vrot.slane %v3440_v53, %v3149_v35  ;;  %v914_v30 = vadd.bf16 %v882_v60, %v487_v8  ;;  %v231_v48 = vrot.slane %v3862_v45, %v3149_v35  ;;  %v1493_v60 = vld [vmem:[%s3848_s4 + $0xf8] sm:$0xff] }
 0x13a   :  { %2479 = vmatpush3.bf16.msra.mxu0 %v2458_v56  ;;  %2594 = vmatpush3.bf16.msra.mxu1 %v2458_v56  ;;  %v1490_v56 = vld [vmem:[%s3848_s4 + $0xe0] sm:$0xff] }
 0x13b   :  { %v883_v2 = vmul.bf16 %v3166_v22, %v820_v44  ;;  %v1362_v25 = vadd.bf16 %v1297_v19, %v914_v30  ;;  %v472_v57 = vmul.bf16 %v3159_v14, %v231_v48  ;;  %v490_v19 = vmul.bf16 %v3159_v14, %v447_v43  ;;  %v2653_v43 = vld [vmem:[%s3847_s3 + $0x54] ss:$8 sps:$4 sm:$0xff]  }
 0x13c   :  { %1601 = vperm.xlu1 %2622, %v1483_v20  }
 0x13d   :  { %v1277_v16 = vpop.permute.xlu1 %1276  ;;  %v915_v32 = vadd.bf16 %v883_v2, %v488_v36  ;;  %v2164_v2 = vld [vmem:[%s3849_s5 + $0xe8] sm:$0xff] }
 0x13e   :  { %v1285_v39 = vrot.slane %v1277_v16, %v3149_v35  ;;  %v1394_v16 = vmul.bf16 1045249613, %v1362_v25 }
 0x140   :  { %v1361_v46 = vadd.bf16 %v1285_v39, %v913_v29  ;;  %1606 = vperm.xlu1 %2622, %v1484_v47   ;;  %v1109_v47 = vpop.permute.xlu0 %1108  ;;  %v1491_v29 = vld [vmem:[%s3848_s4 + $0xe8] sm:$0xff]  ;;  %v3864_v39 = vld [vmem:[#allocation8_spill] sm:$0xff]  ;;  %v1426_v55 = vmax.bf16 %v1394_v16, %v1362_v25 }
 0x141   :  { %v633_v34 = vrot.slane %v3864_v39, %v3149_v35  ;;  %v1117_v11 = vrot.slane %v1109_v47, %v3149_v35 }
 0x142   :  { %v1393_v51 = vmul.bf16 1045249613, %v1361_v46  ;;  %v636_v12 = vpop.permute.xlu1 %635 }
 0x143   :  { %v644_v28 = vrot.slane %v636_v12, %v3149_v35  ;;  %v866_v59 = vmul.bf16 %v3166_v22, %v633_v34 }
 0x144   :  { %v1425_v41 = vmax.bf16 %v1393_v51, %v1361_v46  ;;  %1611 = vperm.xlu1 %2622, %v1485_v37   ;;  %v3865_v51 = vld [vmem:[#allocation13_spill] sm:$0xff]  ;;  %v1121_v8 = vpop.permute.xlu0 %1120 }
 0x145   :  { %v867_v20 = vmul.bf16 %v3166_v22, %v644_v28  ;;  %v435_v12 = vrot.slane %v3865_v51, %v3149_v35  ;;  %v898_v27 = vadd.bf16 %v866_v59, %v471_v61  ;;  %v1129_v28 = vrot.slane %v1121_v8, %v3149_v35  ;;  %v2629_v51 = vld [vmem:[%s3847_s3 + $0x14] ss:$8 sps:$4 sm:$0xff]   ;;  %v2634_v59 = vld [vmem:[%s3847_s3 + $0x90] ss:$8 sps:$4 sm:$0xff]   ;;  %v2663_v8 = vld [vmem:[%s3847_s3 + $0x60] ss:$8 sps:$4 sm:$0xff]  }
 0x146   :  { %v2467_v7 = vcombine.low %v1424_v17, %v1425_v41  ;;  %v3866_v17 = vld [vmem:[#allocation12_spill] sm:$0xff] }
 0x147   :  { %v1073_v10 = vpop.permute.xlu1 %1072  ;;  %v899_v50 = vadd.bf16 %v867_v20, %v472_v57  ;;  %v2166_v57 = vld [vmem:[%s3849_s5 + $0xf8] sm:$0xff] }
 0x148   :  { %v1081_v1 = vrot.slane %v1073_v10, %v3149_v35  ;;  %1616 = vperm.xlu1 %2622, %v1486_v15   ;;  %2480 = vmatprep.subr.bf16.mxu0 %v2467_v7  ;;  %v243_v15 = vrot.slane %v3866_v17, %v3149_v35  ;;  %v2639_v17 = vld [vmem:[%s3847_s3 + $0x20] ss:$8 sps:$4 sm:$0xff]  }
 0x149   :  { %2587 = vmatprep.subr.bf16.mxu1 %v2467_v7  ;;  %v1347_v0 = vadd.bf16 %v1117_v11, %v899_v50 }
 0x14a   :  { %v1344_v52 = vadd.bf16 %v1081_v1, %v896_v42  ;;  %v3867_v1 = vld [vmem:[#allocation9_spill] sm:$0xff] }
 0x14c   :  { %v1376_v4 = vmul.bf16 1045249613, %v1344_v52  ;;  %1621 = vperm.xlu1 %2622, %v1487_v23   ;;  %v823_v38 = vpop.permute.xlu1 %822  ;;  %v655_v23 = vrot.slane %v3867_v1, %v3149_v35  ;;  %v2649_v1 = vld [vmem:[%s3847_s3 + $0xc4] ss:$8 sps:$4 sm:$0xff]  }
 0x14d   :  { %v831_v46 = vrot.slane %v823_v38, %v3149_v35  ;;  %v1379_v38 = vmul.bf16 1045249613, %v1347_v0 }
 0x14e   :  { %v1408_v3 = vmax.bf16 %v1376_v4, %v1344_v52  ;;  %v489_v52 = vmul.bf16 %v3159_v14, %v435_v12  ;;  %v2631_v12 = vld [vmem:[%s3847_s3 + $0x94] ss:$8 sps:$4 sm:$0xff]  }
 0x14f   :  { %v884_v6 = vmul.bf16 %v3166_v22, %v831_v46  ;;  %v1411_v36 = vmax.bf16 %v1379_v38, %v1347_v0  ;;  %v2635_v0 = vld [vmem:[%s3847_s3 + $0x24] ss:$8 sps:$4 sm:$0xff]  }
 0x150   :  { %1626 = vperm.xlu1 %2622, %v1488_v5   ;;  %v834_v9 = vpop.permute.xlu1 %833  ;;  %v2459_v13 = vcombine.low %v1408_v3, %v1409_v31  ;;  %v473_v5 = vmul.bf16 %v3159_v14, %v243_v15  ;;  %v2640_v15 = vld [vmem:[%s3847_s3 + $0xa0] ss:$8 sps:$4 sm:$0xff]   ;;  %v2659_v38 = vld [vmem:[%s3847_s3 + $0x64] ss:$8 sps:$4 sm:$0xff]  }
 0x151   :  { %v842_v10 = vrot.slane %v834_v9, %v3149_v35  ;;  %v916_v44 = vadd.bf16 %v884_v6, %v489_v52  ;;  %v3869_v9 = vld [vmem:[#allocation7_spill] sm:$0xff]  ;;  %v2641_v6 = vld [vmem:[%s3847_s3 + $0x34] ss:$8 sps:$4 sm:$0xff]  }
 0x152   :  { %2481 = vmatpush3.bf16.msra.mxu0 %v2459_v13  ;;  %2595 = vmatpush3.bf16.msra.mxu1 %v2459_v13  ;;  %v255_v13 = vrot.slane %v3869_v9, %v3149_v35  ;;  %v2655_v52 = vld [vmem:[%s3847_s3 + $0xd4] ss:$8 sps:$4 sm:$0xff]  }
 0x153   :  { %v885_v3 = vmul.bf16 %v3166_v22, %v842_v10  ;;  %v2645_v10 = vld [vmem:[%s3847_s3 + $0x30] ss:$8 sps:$4 sm:$0xff]  }
 0x154   :  { %1631 = vperm.xlu1 %2622, %v1489_v18   ;;  %v868_v18 = vmul.bf16 %v3166_v22, %v655_v23  ;;  %v474_v40 = vmul.bf16 %v3159_v14, %v255_v13  ;;  %v2651_v23 = vld [vmem:[%s3847_s3 + $0x40] ss:$8 sps:$4 sm:$0xff]  }
 0x155   :  { %v1301_v53 = vpop.permute.xlu1 %1300  ;;  %v917_v20 = vadd.bf16 %v885_v3, %v490_v19  ;;  %v2667_v3 = vld [vmem:[%s3847_s3 + $0xf4] ss:$8 sps:$4 sm:$0xff]  }
 0x156   :  { %v1309_v63 = vrot.slane %v1301_v53, %v3149_v35  ;;  %v900_v25 = vadd.bf16 %v868_v18, %v473_v5  ;;  %v2661_v5 = vld [vmem:[%s3847_s3 + $0xe4] ss:$8 sps:$4 sm:$0xff]  }
 0x158   :  { %v1363_v24 = vadd.bf16 %v1309_v63, %v915_v32  ;;  %1636 = vperm.xlu1 %2622, %v1490_v56   ;;  %v1348_v58 = vadd.bf16 %v1129_v28, %v900_v25 }
 0x15a   :  { %v1395_v54 = vmul.bf16 1045249613, %v1363_v24  ;;  %v658_v26 = vpop.permute.xlu1 %657  ;;  %v1380_v34 = vmul.bf16 1045249613, %v1348_v58 }
 0x15b   :  { %v666_v33 = vrot.slane %v658_v26, %v3149_v35 }
 0x15c   :  { %v1427_v37 = vmax.bf16 %v1395_v54, %v1363_v24  ;;  %1641 = vperm.xlu1 %2622, %v1491_v29   ;;  %v1412_v11 = vmax.bf16 %v1380_v34, %v1348_v58 }
 0x15d   :  { %v869_v56 = vmul.bf16 %v3166_v22, %v666_v33  ;;  %v2669_v33 = vld [vmem:[%s3847_s3 + $0x70] ss:$8 sps:$4 sm:$0xff]  }
 0x15e   :  { %v2468_v41 = vcombine.low %v1426_v55, %v1427_v37  ;;  %v2623_v55 = vld [vmem:[%s3847_s3] ss:$8 sps:$4 sm:$0xff]  }
 0x15f   :  { %v1097_v7 = vpop.permute.xlu1 %1096  ;;  %v901_v39 = vadd.bf16 %v869_v56, %v474_v40 }
 0x160   :  { %v1105_v42 = vrot.slane %v1097_v7, %v3149_v35  ;;  %1646 = vperm.xlu1 %2622, %v1492_v62   ;;  %2482 = vmatprep.subr.bf16.mxu0 %v2468_v41  ;;  %v2633_v62 = vld [vmem:[%s3847_s3 + $0x10] ss:$8 sps:$4 sm:$0xff]   ;;  %v2643_v7 = vld [vmem:[%s3847_s3 + $0xb4] ss:$8 sps:$4 sm:$0xff]  }
 0x161   :  { %2588 = vmatprep.subr.bf16.mxu1 %v2468_v41  ;;  %v2637_v41 = vld [vmem:[%s3847_s3 + $0xa4] ss:$8 sps:$4 sm:$0xff]  }
 0x162   :  { %v1346_v4 = vadd.bf16 %v1105_v42, %v898_v27  ;;  %v2646_v27 = vld [vmem:[%s3847_s3 + $0xb0] ss:$8 sps:$4 sm:$0xff]   ;;  %v2647_v42 = vld [vmem:[%s3847_s3 + $0x44] ss:$8 sps:$4 sm:$0xff]  }
 0x163   :  { %v1313_v31 = vpop.permute.xlu1 %1312 }
 0x164   :  { %v1378_v21 = vmul.bf16 1045249613, %v1346_v4  ;;  %v1321_v30 = vrot.slane %v1313_v31, %v3149_v35  ;;  %1651 = vperm.xlu1 %2622, %v1493_v60   ;;  %v2657_v60 = vld [vmem:[%s3847_s3 + $0x50] ss:$8 sps:$4 sm:$0xff]   ;;  %v2664_v31 = vld [vmem:[%s3847_s3 + $0xe0] ss:$8 sps:$4 sm:$0xff]  }
 0x166   :  { %v1410_v45 = vmax.bf16 %v1378_v21, %v1346_v4  ;;  %v1364_v48 = vadd.bf16 %v1321_v30, %v916_v44  ;;  %v2658_v4 = vld [vmem:[%s3847_s3 + $0xd0] ss:$8 sps:$4 sm:$0xff]   ;;  %v2665_v44 = vld [vmem:[%s3847_s3 + $0x74] ss:$8 sps:$4 sm:$0xff]   ;;  %v1497_v30 = vpop.permute.xlu0 %1496 }
 0x167   :  { %v1325_v53 = vpop.permute.xlu1 %1324  ;;  %v2670_v21 = vld [vmem:[%s3847_s3 + $0xf0] ss:$8 sps:$4 sm:$0xff]  }
 0x168   :  { %v1333_v32 = vrot.slane %v1325_v53, %v3149_v35  ;;  %2314 = vperm.xlu1 %2622, %v2164_v2   ;;  %v2460_v63 = vcombine.low %v1410_v45, %v1411_v36  ;;  %v1396_v24 = vmul.bf16 1045249613, %v1364_v48 }
 0x16a   :  { %v1365_v16 = vadd.bf16 %v1333_v32, %v917_v20  ;;  %2483 = vmatpush3.bf16.msra.mxu0 %v2460_v63  ;;  %2596 = vmatpush3.bf16.msra.mxu1 %v2460_v63  ;;  %v1428_v50 = vmax.bf16 %v1396_v24, %v1364_v48  ;;  %v3640_v13 = vpop.permute.xlu0 %1506 }
 0x16b   :  { %v1133_v47 = vpop.permute.xlu1 %1132 }
 0x16c   :  { %v1397_v29 = vmul.bf16 1045249613, %v1365_v16  ;;  %v1141_v22 = vrot.slane %v1133_v47, %v3149_v35  ;;  %2324 = vperm.xlu1 %2622, %v2166_v57   ;;  %v2626_v35 = vld [vmem:[%s3847_s3 + $0x80] ss:$8 sps:$4 sm:$0xff]  }
 0x16e   :  { %v1429_v54 = vmax.bf16 %v1397_v29, %v1365_v16  ;;  %v1349_v26 = vadd.bf16 %v1141_v22, %v901_v39  ;;  %v3644_v19 = vpop.permute.xlu0 %1516 }
 0x16f   :  { %v1502_v9 = vpop.permute.xlu1 %1501 }
 0x170   :  { %v1381_v46 = vmul.bf16 1045249613, %v1349_v26  ;;  %v2469_v61 = vcombine.low %v1428_v50, %v1429_v54 }
 0x172   :  { %v1413_v37 = vmax.bf16 %v1381_v46, %v1349_v26  ;;  %2484 = vmatprep.subr.bf16.mxu0 %v2469_v61  ;;  %2589 = vmatprep.subr.bf16.mxu1 %v2469_v61  ;;  %v3648_v28 = vpop.permute.xlu0 %1526 }
 0x173   :  { %v3642_v18 = vpop.permute.xlu1 %1511 }
 0x174   :  { %v2461_v14 = vcombine.low %v1412_v11, %v1413_v37 }
 0x176   :  { %2485 = vmatpush3.bf16.msra.mxu0 %v2461_v14  ;;  %2597 = vmatpush3.bf16.msra.mxu1 %v2461_v14  ;;  %v3652_v48 = vpop.permute.xlu0 %1536 }
 0x177   :  { %v3646_v2 = vpop.permute.xlu1 %1521 }
 0x179   :  { %1943 = vmatmul.mubr.bf16.vlgmr.msra.gmra.mrb[0].mxu0 %v2623_v55  ;;  %2007 = vmatmul.mubr.bf16.vlgmr.msra.gmra.mrb[0].mxu1 %v2626_v35 }
 0x17a   :  { %1950 = vmatprep.mubr.bf16.mxu0 %v2629_v51  ;;  %2014 = vmatprep.mubr.bf16.mxu1 %v2631_v12  ;;  %v3656_v25 = vpop.permute.xlu0 %1546 }
 0x17b   :  { %v3650_v45 = vpop.permute.xlu1 %1531 }
 0x17e   :  { %v3660_v56 = vpop.permute.xlu0 %1556 }
 0x17f   :  { %v3654_v36 = vpop.permute.xlu1 %1541 }
 0x181   :  { %1951 = vmatmul.mubr.bf16.gmra.mrb[4].mxu0 %v2633_v62  ;;  %2015 = vmatmul.mubr.bf16.gmra.mrb[4].mxu1 %v2634_v59 }
 0x182   :  { %1958 = vmatprep.mubr.bf16.mxu0 %v2635_v0  ;;  %2022 = vmatprep.mubr.bf16.mxu1 %v2637_v41  ;;  %v3664_v32 = vpop.permute.xlu0 %1566 }
 0x183   :  { %v3658_v53 = vpop.permute.xlu1 %1551 }
 0x186   :  { %v3668_v57 = vpop.permute.xlu0 %1576 }
 0x187   :  { %v3662_v20 = vpop.permute.xlu1 %1561 }
 0x189   :  { %1959 = vmatmul.mubr.bf16.gmra.mrb[8].mxu0 %v2639_v17  ;;  %2023 = vmatmul.mubr.bf16.gmra.mrb[8].mxu1 %v2640_v15 }
 0x18a   :  { %1966 = vmatprep.mubr.bf16.mxu0 %v2641_v6  ;;  %2030 = vmatprep.mubr.bf16.mxu1 %v2643_v7  ;;  %v3672_v58 = vpop.permute.xlu0 %1586 }
 0x18b   :  { %v3666_v63 = vpop.permute.xlu1 %1571 }
 0x18e   :  { %v3676_v16 = vpop.permute.xlu0 %1596 }
 0x18f   :  { %v3670_v40 = vpop.permute.xlu1 %1581 }
 0x191   :  { %1967 = vmatmul.mubr.bf16.gmra.mrb[12].mxu0 %v2645_v10  ;;  %2031 = vmatmul.mubr.bf16.gmra.mrb[12].mxu1 %v2646_v27 }
 0x192   :  { %1974 = vmatprep.mubr.bf16.mxu0 %v2647_v42  ;;  %2038 = vmatprep.mubr.bf16.mxu1 %v2649_v1  ;;  %v2175_v29 = vpop.permute.xlu0 %2174 }
 0x193   :  { %v3674_v24 = vpop.permute.xlu1 %1591 }
 0x196   :  { %v3680_v22 = vpop.permute.xlu0 %2184 }
 0x197   :  { %v2170_v47 = vpop.permute.xlu1 %2169 }
 0x199   :  { %1975 = vmatmul.mubr.bf16.gmra.mrb[16].mxu0 %v2651_v23  ;;  %2039 = vmatmul.mubr.bf16.gmra.mrb[16].mxu1 %v2652_v49 }
 0x19a   :  { %1982 = vmatprep.mubr.bf16.mxu0 %v2653_v43  ;;  %2046 = vmatprep.mubr.bf16.mxu1 %v2655_v52  ;;  %v3684_v50 = vpop.permute.xlu0 %2194 }
 0x19b   :  { %v3678_v39 = vpop.permute.xlu1 %2179 }
 0x19e   :  { %v3688_v26 = vpop.permute.xlu0 %2204 }
 0x19f   :  { %v3682_v34 = vpop.permute.xlu1 %2189 }
 0x1a1   :  { %1983 = vmatmul.mubr.bf16.gmra.mrb[20].mxu0 %v2657_v60  ;;  %2047 = vmatmul.mubr.bf16.gmra.mrb[20].mxu1 %v2658_v4 }
 0x1a2   :  { %1990 = vmatprep.mubr.bf16.mxu0 %v2659_v38  ;;  %2054 = vmatprep.mubr.bf16.mxu1 %v2661_v5  ;;  %v3692_v61 = vpop.permute.xlu0 %2214 }
 0x1a3   :  { %v3686_v54 = vpop.permute.xlu1 %2199 }
 0x1a6   :  { %v3696_v37 = vpop.permute.xlu0 %2224 }
 0x1a7   :  { %v3690_v46 = vpop.permute.xlu1 %2209 }
 0x1a9   :  { %1991 = vmatmul.mubr.bf16.gmra.mrb[24].mxu0 %v2663_v8  ;;  %2055 = vmatmul.mubr.bf16.gmra.mrb[24].mxu1 %v2664_v31 }
 0x1aa   :  { %1998 = vmatprep.mubr.bf16.mxu0 %v2665_v44  ;;  %2062 = vmatprep.mubr.bf16.mxu1 %v2667_v3  ;;  %v3700_v55 = vpop.permute.xlu0 %2234 }
 0x1ab   :  { %v3694_v11 = vpop.permute.xlu1 %2219 }
 0x1ae   :  { %v3708_v49 = vpop.permute.xlu0 %2244 }
 0x1af   :  { %v3698_v14 = vpop.permute.xlu1 %2229 }
 0x1b1   :  { %1999 = vmatmul.mubr.bf16.gmra.mrb[28].mxu0 %v2669_v33  ;;  %2063 = vmatmul.mubr.bf16.gmra.mrb[28].mxu1 %v2670_v21 }
 0x1b3   :  { %v3702_v35 = vpop.permute.xlu1 %2239 }
 0x1b7   :  { %v3710_v43 = vpop.permute.xlu1 %2249 }
 0x24c   :  { %v2486_v51 = vpop.f32.mrb[0].mxu0  ;;  %v2534_v12 = vpop.f32.mrb[0].mxu1 }
 0x24d   :  { %v2487_v62 = vpop.f32.mrb[1].mxu0  ;;  %v2535_v59 = vpop.f32.mrb[1].mxu1 }
 0x24e   :  { %v2488_v0 = vadd.f32 %v2487_v62, %v2486_v51  ;;  %v3704_v41 = vadd.f32 %v2535_v59, %v2534_v12  ;;  %v2489_v17 = vpop.f32.mrb[2].mxu0  ;;  %v2537_v15 = vpop.f32.mrb[2].mxu1 }
 0x24f   :  { %v2490_v6 = vpop.f32.mrb[3].mxu0  ;;  %v2538_v7 = vpop.f32.mrb[3].mxu1 }
 0x250   :  { %v1945_v10 = vadd.f32 %v2488_v0, %v1497_v30  ;;  %v2491_v27 = vadd.f32 %v2490_v6, %v2489_v17  ;;  %v3706_v42 = vadd.f32 %v2538_v7, %v2537_v15  ;;  %v3718_v6 = vpop.permute.xlu0 %2254  ;;  %v3720_v7 = vpop.permute.xlu1 %1601 }
 0x252   :  { %v2071_v1 = vmul.f32 0.2, %v1945_v10  ;;  %v1948_v23 = vadd.f32 %v2491_v27, %v1502_v9 }
 0x254   :  { %v2103_v52 = vmax.f32 %v1945_v10, %v2071_v1  ;;  %v2072_v60 = vmul.f32 0.2, %v1948_v23  ;;  %v2492_v4 = vpop.f32.mrb[4].mxu0  ;;  %v2540_v38 = vpop.f32.mrb[4].mxu1 }
 0x255   :  { %v2493_v5 = vpop.f32.mrb[5].mxu0  ;;  %v2541_v8 = vpop.f32.mrb[5].mxu1 }
 0x256   :  { %v2104_v31 = vmax.f32 %v1948_v23, %v2072_v60  ;;  %v2495_v44 = vpop.f32.mrb[6].mxu0  ;;  %v2543_v3 = vpop.f32.mrb[6].mxu1  ;;  %v2494_v33 = vadd.f32 %v2493_v5, %v2492_v4  ;;  %v3712_v21 = vadd.f32 %v2541_v8, %v2540_v38  ;;  %v2327_v12 = vmul.f32 %v2170_v47, %v2103_v52 }
 0x257   :  { %v2496_v30 = vpop.f32.mrb[7].mxu0  ;;  %v2544_v51 = vpop.f32.mrb[7].mxu1 }
 0x258   :  { %v2328_v9 = vmul.f32 %v2175_v29, %v2104_v31  ;;  %v2497_v62 = vadd.f32 %v2496_v30, %v2495_v44  ;;  %v3714_v59 = vadd.f32 %v2544_v51, %v2543_v3  ;;  %v1953_v0 = vadd.f32 %v2494_v33, %v3640_v13 }
 0x25a   :  { %v2359_v17 = vadd.f32 %v2328_v9, %v2327_v12  ;;  %v1956_v15 = vadd.f32 %v2497_v62, %v3642_v18  ;;  %v2073_v10 = vmul.f32 0.2, %v1953_v0  ;;  %v3729_v9 = vpop.permute.xlu0 %2259  ;;  %v3731_v62 = vpop.permute.xlu1 %1606 }
 0x25c   :  { %v2074_v27 = vmul.f32 0.2, %v1956_v15  ;;  %v2498_v1 = vpop.f32.mrb[8].mxu0  ;;  %v2546_v23 = vpop.f32.mrb[8].mxu1  ;;  %v2105_v60 = vmax.f32 %v1953_v0, %v2073_v10 }
 0x25d   :  { %v2499_v4 = vpop.f32.mrb[9].mxu0  ;;  %v2547_v47 = vpop.f32.mrb[9].mxu1 }
 0x25e   :  { %v2106_v29 = vmax.f32 %v1956_v15, %v2074_v27  ;;  %v2500_v52 = vadd.f32 %v2499_v4, %v2498_v1  ;;  %v3722_v38 = vadd.f32 %v2547_v47, %v2546_v23  ;;  %v2501_v5 = vpop.f32.mrb[10].mxu0  ;;  %v2549_v13 = vpop.f32.mrb[10].mxu1  ;;  %v2329_v8 = vmul.f32 %v3678_v39, %v2105_v60 }
 0x25f   :  { %v2502_v18 = vpop.f32.mrb[11].mxu0  ;;  %v2550_v31 = vpop.f32.mrb[11].mxu1 }
 0x260   :  { %v2330_v44 = vmul.f32 %v3680_v22, %v2106_v29  ;;  %v1961_v3 = vadd.f32 %v2500_v52, %v3644_v19  ;;  %v2360_v33 = vadd.f32 %v2359_v17, %v2329_v8  ;;  %v2503_v30 = vadd.f32 %v2502_v18, %v2501_v5 }
 0x261   :  { %v3727_v51 = vadd.f32 %v2550_v31, %v2549_v13 }
 0x262   :  { %v2075_v12 = vmul.f32 0.2, %v1961_v3  ;;  %v2361_v0 = vadd.f32 %v2360_v33, %v2330_v44  ;;  %v1964_v15 = vadd.f32 %v2503_v30, %v3646_v2  ;;  %v3744_v33 = vpop.permute.xlu1 %1611 }
 0x264   :  { %v2107_v10 = vmax.f32 %v1961_v3, %v2075_v12  ;;  %v2504_v39 = vpop.f32.mrb[12].mxu0  ;;  %v2552_v27 = vpop.f32.mrb[12].mxu1  ;;  %v2076_v1 = vmul.f32 0.2, %v1964_v15 }
 0x265   :  { %v2505_v23 = vpop.f32.mrb[13].mxu0  ;;  %v2553_v22 = vpop.f32.mrb[13].mxu1 }
 0x266   :  { %v2331_v19 = vmul.f32 %v3682_v34, %v2107_v10  ;;  %v2506_v17 = vadd.f32 %v2505_v23, %v2504_v39  ;;  %v3735_v60 = vadd.f32 %v2553_v22, %v2552_v27  ;;  %v2507_v4 = vpop.f32.mrb[14].mxu0  ;;  %v2555_v47 = vpop.f32.mrb[14].mxu1  ;;  %v2108_v29 = vmax.f32 %v1964_v15, %v2076_v1 }
 0x267   :  { %v2508_v52 = vpop.f32.mrb[15].mxu0  ;;  %v2556_v5 = vpop.f32.mrb[15].mxu1 }
 0x268   :  { %v2362_v13 = vadd.f32 %v2361_v0, %v2331_v19  ;;  %v1969_v8 = vadd.f32 %v2506_v17, %v3648_v28  ;;  %v2509_v2 = vadd.f32 %v2508_v52, %v2507_v4  ;;  %v2332_v18 = vmul.f32 %v3684_v50, %v2108_v29  ;;  %v3742_v34 = vpop.permute.xlu0 %2264 }
 0x269   :  { %v3739_v31 = vadd.f32 %v2556_v5, %v2555_v47 }
 0x26a   :  { %v2077_v44 = vmul.f32 0.2, %v1969_v8  ;;  %v1972_v3 = vadd.f32 %v2509_v2, %v3650_v45  ;;  %v2363_v30 = vadd.f32 %v2362_v13, %v2332_v18  ;;  %v3756_v18 = vpop.permute.xlu1 %1616 }
 0x26c   :  { %v2109_v12 = vmax.f32 %v1969_v8, %v2077_v44  ;;  %v2078_v15 = vmul.f32 0.2, %v1972_v3  ;;  %v2510_v10 = vpop.f32.mrb[16].mxu0  ;;  %v2558_v39 = vpop.f32.mrb[16].mxu1 }
 0x26d   :  { %v2511_v0 = vpop.f32.mrb[17].mxu0  ;;  %v2559_v27 = vpop.f32.mrb[17].mxu1 }
 0x26e   :  { %v2333_v28 = vmul.f32 %v3686_v54, %v2109_v12  ;;  %v2110_v1 = vmax.f32 %v1972_v3, %v2078_v15  ;;  %v2512_v50 = vadd.f32 %v2511_v0, %v2510_v10  ;;  %v2513_v23 = vpop.f32.mrb[18].mxu0  ;;  %v2561_v22 = vpop.f32.mrb[18].mxu1  ;;  %v3747_v19 = vadd.f32 %v2559_v27, %v2558_v39 }
 0x26f   :  { %v2514_v45 = vpop.f32.mrb[19].mxu0  ;;  %v2562_v17 = vpop.f32.mrb[19].mxu1 }
 0x270   :  { %v2364_v4 = vadd.f32 %v2363_v30, %v2333_v28  ;;  %v2334_v47 = vmul.f32 %v3688_v26, %v2110_v1  ;;  %v1977_v29 = vadd.f32 %v2512_v50, %v3652_v48  ;;  %v2515_v52 = vadd.f32 %v2514_v45, %v2513_v23  ;;  %v3754_v2 = vpop.permute.xlu0 %2269 }
 0x271   :  { %v3751_v5 = vadd.f32 %v2562_v17, %v2561_v22 }
 0x272   :  { %v2365_v13 = vadd.f32 %v2364_v4, %v2334_v47  ;;  %v2079_v8 = vmul.f32 0.2, %v1977_v29  ;;  %v1980_v54 = vadd.f32 %v2515_v52, %v3654_v36 }
 0x274   :  { %v2111_v44 = vmax.f32 %v1977_v29, %v2079_v8  ;;  %v2080_v3 = vmul.f32 0.2, %v1980_v54  ;;  %v2516_v12 = vpop.f32.mrb[20].mxu0  ;;  %v2564_v15 = vpop.f32.mrb[20].mxu1 }
 0x275   :  { %v2517_v30 = vpop.f32.mrb[21].mxu0  ;;  %v2565_v10 = vpop.f32.mrb[21].mxu1 }
 0x276   :  { %v2335_v26 = vmul.f32 %v3690_v46, %v2111_v44  ;;  %v2112_v48 = vmax.f32 %v1980_v54, %v2080_v3  ;;  %v2518_v39 = vadd.f32 %v2517_v30, %v2516_v12  ;;  %v3759_v0 = vadd.f32 %v2565_v10, %v2564_v15  ;;  %v2519_v27 = vpop.f32.mrb[22].mxu0  ;;  %v2567_v28 = vpop.f32.mrb[22].mxu1 }
 0x277   :  { %v2520_v1 = vpop.f32.mrb[23].mxu0  ;;  %v2568_v36 = vpop.f32.mrb[23].mxu1 }
 0x278   :  { %v2366_v50 = vadd.f32 %v2365_v13, %v2335_v26  ;;  %v2336_v23 = vmul.f32 %v3692_v61, %v2112_v48  ;;  %v1985_v22 = vadd.f32 %v2518_v39, %v3656_v25  ;;  %v2521_v45 = vadd.f32 %v2520_v1, %v2519_v27  ;;  %v3765_v29 = vpop.permute.xlu0 %2274  ;;  %v3767_v46 = vpop.permute.xlu1 %1621 }
 0x279   :  { %v3763_v17 = vadd.f32 %v2568_v36, %v2567_v28 }
 0x27a   :  { %v2367_v4 = vadd.f32 %v2366_v50, %v2336_v23  ;;  %v2081_v47 = vmul.f32 0.2, %v1985_v22  ;;  %v1988_v52 = vadd.f32 %v2521_v45, %v3658_v53 }
 0x27c   :  { %v2113_v8 = vmax.f32 %v1985_v22, %v2081_v47  ;;  %v2522_v54 = vpop.f32.mrb[24].mxu0  ;;  %v2570_v44 = vpop.f32.mrb[24].mxu1  ;;  %v2082_v3 = vmul.f32 0.2, %v1988_v52 }
 0x27d   :  { %v2523_v13 = vpop.f32.mrb[25].mxu0  ;;  %v2571_v12 = vpop.f32.mrb[25].mxu1 }
 0x27e   :  { %v2337_v61 = vmul.f32 %v3694_v11, %v2113_v8  ;;  %v2524_v25 = vadd.f32 %v2523_v13, %v2522_v54  ;;  %v3771_v15 = vadd.f32 %v2571_v12, %v2570_v44  ;;  %v2525_v30 = vpop.f32.mrb[26].mxu0  ;;  %v2573_v10 = vpop.f32.mrb[26].mxu1  ;;  %v2114_v26 = vmax.f32 %v1988_v52, %v2082_v3 }
 0x27f   :  { %v2526_v48 = vpop.f32.mrb[27].mxu0  ;;  %v2574_v39 = vpop.f32.mrb[27].mxu1 }
 0x280   :  { %v2368_v27 = vadd.f32 %v2367_v4, %v2337_v61  ;;  %v1993_v28 = vadd.f32 %v2524_v25, %v3660_v56  ;;  %v2527_v53 = vadd.f32 %v2526_v48, %v2525_v30  ;;  %v2338_v1 = vmul.f32 %v3696_v37, %v2114_v26  ;;  %v3778_v11 = vpop.permute.xlu0 %2279  ;;  %v3780_v22 = vpop.permute.xlu1 %1626 }
 0x281   :  { %v3775_v36 = vadd.f32 %v2574_v39, %v2573_v10  ;;  %v2009_v56 = vadd.f32 %v3704_v41, %v3668_v57  ;;  %v2012_v61 = vadd.f32 %v3706_v42, %v3670_v40 }
 0x282   :  { %v2083_v50 = vmul.f32 0.2, %v1993_v28  ;;  %v1996_v23 = vadd.f32 %v2527_v53, %v3662_v20  ;;  %v2369_v45 = vadd.f32 %v2368_v27, %v2338_v1 }
 0x284   :  { %v2115_v47 = vmax.f32 %v1993_v28, %v2083_v50  ;;  %v2084_v52 = vmul.f32 0.2, %v1996_v23  ;;  %v2528_v8 = vpop.f32.mrb[28].mxu0  ;;  %v2576_v54 = vpop.f32.mrb[28].mxu1  ;;  %v2017_v28 = vadd.f32 %v3712_v21, %v3672_v58  ;;  %v2088_v50 = vmul.f32 0.2, %v2012_v61 }
 0x285   :  { %v2529_v4 = vpop.f32.mrb[29].mxu0  ;;  %v2577_v44 = vpop.f32.mrb[29].mxu1 }
 0x286   :  { %v2339_v37 = vmul.f32 %v3698_v14, %v2115_v47  ;;  %v2116_v3 = vmax.f32 %v1996_v23, %v2084_v52  ;;  %v2530_v13 = vadd.f32 %v2529_v4, %v2528_v8  ;;  %v2531_v12 = vpop.f32.mrb[30].mxu0  ;;  %v2579_v20 = vpop.f32.mrb[30].mxu1  ;;  %v3787_v25 = vadd.f32 %v2577_v44, %v2576_v54 }
 0x287   :  { %v2532_v30 = vpop.f32.mrb[31].mxu0  ;;  %v2580_v10 = vpop.f32.mrb[31].mxu1  ;;  %v2087_v14 = vmul.f32 0.2, %v2009_v56  ;;  %v2089_v47 = vmul.f32 0.2, %v2017_v28  ;;  %v2025_v52 = vadd.f32 %v3722_v38, %v3676_v16  ;;  %v2120_v21 = vmax.f32 %v2012_v61, %v2088_v50 }
 0x288   :  { %v2370_v26 = vadd.f32 %v2369_v45, %v2339_v37  ;;  %v2340_v48 = vmul.f32 %v3700_v55, %v2116_v3  ;;  %v2001_v57 = vadd.f32 %v2530_v13, %v3664_v32  ;;  %v2533_v41 = vadd.f32 %v2532_v30, %v2531_v12  ;;  %v3791_v39 = vpop.permute.xlu0 %2284  ;;  %v1632_v1 = vpop.permute.xlu1 %1631 }
 0x289   :  { %v3793_v27 = vadd.f32 %v2580_v10, %v2579_v20  ;;  %v2020_v55 = vadd.f32 %v3714_v59, %v3674_v24  ;;  %v2119_v45 = vmax.f32 %v2009_v56, %v2087_v14  ;;  %v2121_v56 = vmax.f32 %v2017_v28, %v2089_v47 }
 0x28a   :  { %v2371_v53 = vadd.f32 %v2370_v26, %v2340_v48  ;;  %v2085_v40 = vmul.f32 0.2, %v2001_v57  ;;  %v2004_v42 = vadd.f32 %v2533_v41, %v3666_v63  ;;  %v2028_v63 = vadd.f32 %v3727_v51, %v3720_v7 }
 0x28b   :  { %v2090_v4 = vmul.f32 0.2, %v2020_v55  ;;  %v2343_v59 = vmul.f32 %v3710_v43, %v2119_v45  ;;  %v2091_v3 = vmul.f32 0.2, %v2025_v52  ;;  %v2033_v16 = vadd.f32 %v3735_v60, %v3731_v62 }
 0x28c   :  { %v2117_v23 = vmax.f32 %v2001_v57, %v2085_v40  ;;  %v2086_v32 = vmul.f32 0.2, %v2004_v42  ;;  %v2290_v58 = vpop.permute.xlu0 %2289  ;;  %v1637_v24 = vpop.permute.xlu1 %1636  ;;  %v2092_v12 = vmul.f32 0.2, %v2028_v63  ;;  %v2036_v20 = vadd.f32 %v3739_v31, %v3744_v33 }
 0x28d   :  { %v2122_v13 = vmax.f32 %v2020_v55, %v2090_v4  ;;  %v2345_v43 = vmul.f32 %v3729_v9, %v2121_v56  ;;  %v2123_v61 = vmax.f32 %v2025_v52, %v2091_v3  ;;  %v2093_v30 = vmul.f32 0.2, %v2033_v16 }
 0x28e   :  { %v2341_v8 = vmul.f32 %v3702_v35, %v2117_v23  ;;  %v2118_v54 = vmax.f32 %v2004_v42, %v2086_v32  ;;  %v2344_v35 = vmul.f32 %v3718_v6, %v2120_v21  ;;  %v2044_v62 = vadd.f32 %v3751_v5, %v3767_v46 }
 0x28f   :  { %v2346_v6 = vmul.f32 %v3742_v34, %v2122_v13  ;;  %v2124_v60 = vmax.f32 %v2028_v63, %v2092_v12  ;;  %v2094_v48 = vmul.f32 0.2, %v2036_v20  ;;  %v2347_v33 = vmul.f32 %v3754_v2, %v2123_v61 }
 0x290   :  { %v2372_v44 = vadd.f32 %v2371_v53, %v2341_v8  ;;  %v2342_v37 = vmul.f32 %v3708_v49, %v2118_v54  ;;  %v2295_v51 = vpop.permute.xlu0 %2294  ;;  %v2041_v49 = vadd.f32 %v3747_v19, %v3756_v18  ;;  %v1642_v26 = vpop.permute.xlu1 %1641  ;;  %v2125_v41 = vmax.f32 %v2033_v16, %v2093_v30 }
 0x291   :  { %v2049_v19 = vadd.f32 %v3759_v0, %v3780_v22  ;;  %v2096_v14 = vmul.f32 0.2, %v2044_v62  ;;  %v2348_v28 = vmul.f32 %v3765_v29, %v2124_v60  ;;  %v2126_v53 = vmax.f32 %v2036_v20, %v2094_v48 }
 0x292   :  { %v2373_v38 = vadd.f32 %v2372_v44, %v2342_v37  ;;  %v2095_v31 = vmul.f32 0.2, %v2041_v49  ;;  %v2052_v5 = vadd.f32 %v3763_v17, %v1632_v1  ;;  %v2349_v42 = vmul.f32 %v3778_v11, %v2125_v41 }
 0x293   :  { %v2097_v50 = vmul.f32 0.2, %v2049_v19  ;;  %v2057_v2 = vadd.f32 %v3771_v15, %v1637_v24  ;;  %v2128_v23 = vmax.f32 %v2044_v62, %v2096_v14  ;;  %v2350_v0 = vmul.f32 %v3791_v39, %v2126_v53 }
 0x294   :  { %v2374_v7 = vadd.f32 %v2373_v38, %v2343_v59  ;;  %v2300_v18 = vpop.permute.xlu0 %2299  ;;  %v1647_v34 = vpop.permute.xlu1 %1646  ;;  %v2127_v40 = vmax.f32 %v2041_v49, %v2095_v31  ;;  %v2098_v22 = vmul.f32 0.2, %v2052_v5  ;;  %v2060_v32 = vadd.f32 %v3775_v36, %v1642_v26 }
 0x295   :  { %v2129_v52 = vmax.f32 %v2049_v19, %v2097_v50  ;;  %v2099_v17 = vmul.f32 0.2, %v2057_v2  ;;  %v2065_v1 = vadd.f32 %v3787_v25, %v1647_v34  ;;  %v2352_v11 = vmul.f32 %v2295_v51, %v2128_v23 }
 0x296   :  { %v2375_v10 = vadd.f32 %v2374_v7, %v2344_v35  ;;  %v2351_v47 = vmul.f32 %v2290_v58, %v2127_v40  ;;  %v2130_v21 = vmax.f32 %v2052_v5, %v2098_v22  ;;  %v2100_v4 = vmul.f32 0.2, %v2060_v32 }
 0x297   :  { %v2353_v44 = vmul.f32 %v2300_v18, %v2129_v52  ;;  %v2131_v39 = vmax.f32 %v2057_v2, %v2099_v17  ;;  %v2101_v37 = vmul.f32 0.2, %v2065_v1  ;;  %v2397_v48 = vstv %s3850_s6 }
 0x298   :  { %v2376_v57 = vadd.f32 %v2375_v10, %v2345_v43  ;;  %v2305_v29 = vpop.permute.xlu0 %2304  ;;  %v1652_v54 = vpop.permute.xlu1 %1651  ;;  %v2132_v56 = vmax.f32 %v2060_v32, %v2100_v4 }
 0x299   :  { %v2068_v15 = vadd.f32 %v3793_v27, %v1652_v54  ;;  %v2354_v59 = vmul.f32 %v2305_v29, %v2130_v21  ;;  %v2133_v25 = vmax.f32 %v2065_v1, %v2101_v37 }
 0x29a   :  { %v2377_v9 = vadd.f32 %v2376_v57, %v2346_v6 }
 0x29b   :  { %v2102_v58 = vmul.f32 0.2, %v2068_v15 }
 0x29c   :  { %v2378_v46 = vadd.f32 %v2377_v9, %v2347_v33  ;;  %v2310_v36 = vpop.permute.xlu0 %2309  ;;  %v2315_v16 = vpop.permute.xlu1 %2314 }
 0x29d   :  { %v2355_v38 = vmul.f32 %v2310_v36, %v2131_v39  ;;  %v2356_v13 = vmul.f32 %v2315_v16, %v2132_v56  ;;  %v2134_v12 = vmax.f32 %v2068_v15, %v2102_v58 }
 0x29e   :  { %v2379_v55 = vadd.f32 %v2378_v46, %v2348_v28 }
 0x2a0   :  { %v2380_v45 = vadd.f32 %v2379_v55, %v2349_v42  ;;  %v2320_v7 = vpop.permute.xlu0 %2319  ;;  %v2325_v49 = vpop.permute.xlu1 %2324 }
 0x2a1   :  { %v2357_v51 = vmul.f32 %v2320_v7, %v2133_v25  ;;  %v2358_v43 = vmul.f32 %v2325_v49, %v2134_v12 }
 0x2a2   :  { %v2381_v8 = vadd.f32 %v2380_v45, %v2350_v0 }
 0x2a4   :  { %v2382_v63 = vadd.f32 %v2381_v8, %v2351_v47 }
 0x2a6   :  { %v2383_v24 = vadd.f32 %v2382_v63, %v2352_v11 }
 0x2a8   :  { %v2384_v3 = vadd.f32 %v2383_v24, %v2353_v44 }
 0x2aa   :  { %v2385_v35 = vadd.f32 %v2384_v3, %v2354_v59 }
 0x2ac   :  { %v2386_v20 = vadd.f32 %v2385_v35, %v2355_v38 }
 0x2ae   :  { %v2387_v27 = vadd.f32 %v2386_v20, %v2356_v13 }
 0x2b0   :  { %v2388_v61 = vadd.f32 %v2387_v27, %v2357_v51 }
 0x2b2   :  { %v2389_v30 = vadd.f32 %v2388_v61, %v2358_v43 }
 0x2b4   :  { %v2390_v10 = vrot.slane %v2389_v30, 4 }
 0x2b6   :  { %v2391_v26 = vadd.f32 %v2390_v10, %v2389_v30 }
 0x2b8   :  { %v2392_v62 = vrot.slane %v2391_v26, 2 }
 0x2ba   :  { %v2393_v6 = vadd.f32 %v2392_v62, %v2391_v26 }
 0x2bc   :  { %v2394_v60 = vrot.slane %v2393_v6, 1 }
 0x2be   :  { %v2395_v57 = vadd.f32 %v2394_v60, %v2393_v6 }
 0x2c0   :  { %v2398_v31 = vadd.f32 %v2397_v48, %v2395_v57 }
 0x2c2   :  { %v2399_v33 = vsub.f32 0.0, %v2398_v31 }
 0x2c4   :  { %v2400_v41 = vmul.f32 1.442695, %v2399_v33 }
 0x2c6   :  { %2671 = vpow2.f32 %v2400_v41 }
 0x2d0   :  { %v2672_v19 = vpop.eup %2671 }
 0x2d1   :  { %v2402_v9 = vadd.f32 1.0, %v2672_v19 }
 0x2d3   :  { %2673 = vrcp.f32 %v2402_v9 }
 0x2dd   :  { %v2674_v18 = vpop.eup %2673 }
 0x2de   :  { %2405 = vst [vmem:[#allocation3] sm:$0x1] %v2674_v18 }
 0x2df   :  { %2686 = shalt.err (!%p2683_p4)
}
 0x2e0   :  { %s2687_s24 = scalar_lea.hbm %s3851_s7, 16 }
 0x2e1   :  { %p2688_p5 = scmp.ne.s32.totalorder %s3851_s7, %s2687_s24  ;;  %p2691_p6 = scmp.lt.u32.totalorder %s2687_s24, %s3851_s7 }
 0x2e3   :  { %p2693_p7 = pnand %p2691_p6, %p2688_p5 }
 0x2e5   :  { %2696 = shalt.err (!%p2693_p7)
}
 0x2e6   :  { %2415 = dma.vmem_to_hbm [thread:$0]  %s2413_s20, 16, %s3851_s7, [#allocation4]  }
 0x2e7   :  { %2697 = dma.done.wait [#allocation4], 16  }
 0x2e8   :  { %2698 = vsyncadd [#allocation4], 4294967280 }
 0x2e9   :  { %2419 = vsyncpa [#allocation4], 1 }

</bundles_post_ra>
